<compile_context>
chip_gen: v7x
topology: tpu7x:2x2x1
jax: 0.10.0
libtpu: 0.0.40
codegen_flags: <defaults>
</compile_context>

<pallas_src>
import jax
import jax.numpy as jnp
from jax.experimental import pallas as pl
from jax.experimental.pallas import tpu as pltpu


def _make_attention_kernel(p_valid):
    """Builds the kernel; p_valid is the unpadded number of pixels."""

    def kernel(enc_ref, dec_ref, we_ref, wd_ref, wf_ref, batt_ref, bfull_ref,
               awe_ref, alpha_ref):
        BB, Pp, E = enc_ref.shape
        A = we_ref.shape[1]
        cdt = enc_ref.dtype                      # MXU-operand (compute) dtype

        enc = enc_ref[...]                                                # (BB, Pp, E)

        # encoder_att for the whole batch block in one MXU pass (M = BB*Pp rows).
        att1 = jnp.dot(enc.reshape(BB * Pp, E), we_ref[...],
                       preferred_element_type=jnp.float32)               # (BB*Pp, A) f32

        # decoder_att + folded (b_enc + b_dec), f32 accumulation.
        att2 = jnp.dot(dec_ref[...], wd_ref[...],
                       preferred_element_type=jnp.float32) + batt_ref[...]   # (BB, A)

        # relu(att1 + att2.unsqueeze(1)); reshape is layout-free since Pp % 8 == 0.
        h = jnp.maximum(att1.reshape(BB, Pp, A) + att2[:, None, :], 0.0)     # (BB, Pp, A)

        # full_att (A -> 1): VPU broadcast-multiply by the f32 W_full row + lane
        # reduce.  An M-packed MXU (BB*P, A)@(A, 1) variant is equivalent, but
        # both need the same sublane->lane relayout for the (BB, P) logits.
        att = jnp.sum(h * wf_ref[...], axis=-1) + bfull_ref[0]               # (BB, Pp)

        if p_valid < Pp:   # mask wrapper padding so it gets exactly zero weight
            pix = jax.lax.broadcasted_iota(jnp.int32, (BB, Pp), 1)
            att = jnp.where(pix < p_valid, att, -jnp.inf)

        # softmax over pixels (lane axis), max-stabilized, all in f32.
        m = jnp.max(att, axis=-1, keepdims=True)
        e = jnp.exp(att - m)
        alpha = e * pl.reciprocal(jnp.sum(e, axis=-1, keepdims=True), approx=False)

        alpha_ref[...] = alpha                                               # (BB, Pp)

        # attention-weighted encoding on the MXU: batched (BB,1,Pp) @ (BB,Pp,E).
        awe_ref[...] = jnp.einsum("bqp,bpe->bqe", alpha[:, None, :].astype(cdt),
                                  enc, preferred_element_type=jnp.float32)   # (BB,1,E)

    return kernel


def _chip_policy():
    """Returns (default scoped-VMEM limit bytes, prefer >=2 grid steps)."""
    vmem_capacity = None
    try:
        vmem_capacity = int(pltpu.get_tpu_info().vmem_capacity_bytes)
    except Exception:
        vmem_capacity = None
    kind = ""
    try:
        kind = (jax.devices()[0].device_kind or "").lower()
    except Exception:
        pass
    is_v7x = ("v7" in kind) or (vmem_capacity is not None
                                and vmem_capacity <= 64 * 1024 * 1024)
    if vmem_capacity is None:
        vmem_capacity = (64 if is_v7x else 128) * 1024 * 1024
    if is_v7x:
        # v7x: 64 MiB VMEM per TensorCore, 2 TCs -> shard the "parallel" batch axis.
        limit, prefer_multi_step = 40 * 1024 * 1024, True
    else:
        # v5e / v6e: 128 MiB VMEM, 1 TC -> big blocks, extra steps are pure overhead.
        limit, prefer_multi_step = 96 * 1024 * 1024, False
    limit = min(limit, (vmem_capacity * 3) // 4)
    return limit, prefer_multi_step


def _pick_block_batch(B, P, E, D, A, in_itemsize, vmem_budget_bytes,
                      weight_bytes, prefer_multi_step):
    """Largest legal batch block that fits the weight-adjusted VMEM budget.

    Legality: BB is the second-to-last dim of the dec / alpha blocks, so it
    must be a multiple of 8 or equal to the full batch.
    """
    budget = max(vmem_budget_bytes - weight_bytes, 1)
    per_row = (2 * P * E * in_itemsize        # enc tile, double-buffered
               + 2 * D * in_itemsize          # dec tile, double-buffered
               + 3 * P * A * 4                # live (P, A) f32 intermediates
               + 2 * (E + P) * 4)             # awe + alpha output tiles
    cap = max(1, budget // max(per_row, 1))

    valid = [d for d in range(1, B + 1) if B % d == 0 and (d == B or d % 8 == 0)]
    pool = [d for d in valid if d <= cap] or [min(valid)]
    if prefer_multi_step:                     # v7x: keep work for both TensorCores
        multi = [d for d in pool if B // d >= 2]
        if multi:
            pool = multi
    packed = [d for d in pool if (d * P) % 256 == 0]   # fully pack MXU M rows
    return max(packed) if packed else max(pool)


def new_attention_forward(encoder_out, decoder_hidden, params, *,
                          compute_dtype=jnp.bfloat16, vmem_limit_bytes=None):
    """encoder_out: (B, P, E), decoder_hidden: (B, D) -> (awe (B, E), alpha (B, P)).

    compute_dtype controls the MXU-operand precision (bf16 halves HBM traffic;
    jnp.float32 reproduces the PyTorch module numerics).  Accumulation, biases
    and the softmax / awe epilogue stay in f32 either way.
    """
    B, P, E = encoder_out.shape
    D = decoder_hidden.shape[1]
    A = params["W_enc"].shape[1]
    cdt = jnp.dtype(compute_dtype)

    default_limit, prefer_multi_step = _chip_policy()
    vmem_limit = int(vmem_limit_bytes) if vmem_limit_bytes is not None else default_limit

    # Pad pixels to a multiple of 8 so the merged-M reshapes stay layout-free.
    P_pad = ((P + 7) // 8) * 8
    if P_pad != P:
        encoder_out = jnp.pad(encoder_out, ((0, 0), (0, P_pad - P), (0, 0)))

    enc_in = encoder_out.astype(cdt)
    dec_in = decoder_hidden.astype(cdt)
    we = params["W_enc"].astype(cdt)                                   # (E, A)
    wd = params["W_dec"].astype(cdt)                                   # (D, A)
    wf = params["W_full"].reshape(1, A).astype(jnp.float32)            # tiny: keep f32
    b_att = (params["b_enc"] + params["b_dec"]).reshape(1, A).astype(jnp.float32)
    b_full = params["b_full"].reshape(1).astype(jnp.float32)           # scalar via SMEM

    # Weight-aware VMEM budgeting (weights are double-buffered by default).
    weight_bytes = 2 * ((E * A + D * A) * cdt.itemsize + 2 * A * 4)
    BB = _pick_block_batch(B, P_pad, E, D, A, cdt.itemsize,
                           vmem_limit, weight_bytes, prefer_multi_step)

    grid_spec = pltpu.PrefetchScalarGridSpec(
        num_scalar_prefetch=0,
        grid=(B // BB,),
        in_specs=[
            pl.BlockSpec((BB, P_pad, E), lambda b: (b, 0, 0)),          # encoder_out
            pl.BlockSpec((BB, D),        lambda b: (b, 0)),             # decoder_hidden
            pl.BlockSpec((E, A),         lambda b: (0, 0)),             # W_enc (grid-invariant)
            pl.BlockSpec((D, A),         lambda b: (0, 0)),             # W_dec (grid-invariant)
            pl.BlockSpec((1, A),         lambda b: (0, 0)),             # W_full row (f32)
            pl.BlockSpec((1, A),         lambda b: (0, 0)),             # b_enc + b_dec (f32)
            pl.BlockSpec(memory_space=pltpu.MemorySpace.SMEM),          # b_full scalar
        ],
        out_specs=[
            pl.BlockSpec((BB, 1, E),     lambda b: (b, 0, 0)),          # awe
            pl.BlockSpec((BB, P_pad),    lambda b: (b, 0)),             # alpha
        ],
    )

    out_shapes = (
        jax.ShapeDtypeStruct((B, 1, E), jnp.float32),    # attention_weighted_encoding
        jax.ShapeDtypeStruct((B, P_pad), jnp.float32),   # alpha (padded)
    )

    cost = pl.CostEstimate(
        flops=2 * B * P_pad * E * A + 2 * B * D * A
              + 2 * B * P_pad * A + 2 * B * P_pad * E,
        transcendentals=B * P_pad,
        bytes_accessed=(B * P_pad * E + B * D) * cdt.itemsize
                       + (E * A + D * A) * cdt.itemsize
                       + (2 * A + 1) * 4 + (B * E + B * P_pad) * 4,
    )

    awe3, alpha = pl.pallas_call(
        _make_attention_kernel(P),
        out_shape=out_shapes,
        grid_spec=grid_spec,
        cost_estimate=cost,
        compiler_params=pltpu.CompilerParams(
            dimension_semantics=("parallel",),
            vmem_limit_bytes=vmem_limit,
        ),
    )(enc_in, dec_in, we, wd, wf, b_att, b_full)

    alpha = alpha[:, :P] if P_pad != P else alpha
    return awe3[:, 0, :], alpha            # squeeze / slice are free in XLA


def init_params(key, encoder_dim, decoder_dim, attention_dim):
    ks = jax.random.split(key, 6)
    s_e = 1.0 / jnp.sqrt(encoder_dim)
    s_d = 1.0 / jnp.sqrt(decoder_dim)
    s_a = 1.0 / jnp.sqrt(attention_dim)
    return {
        "W_enc":  jax.random.uniform(ks[0], (encoder_dim, attention_dim), jnp.float32, -s_e, s_e),
        "b_enc":  jax.random.uniform(ks[1], (attention_dim,), jnp.float32, -s_e, s_e),
        "W_dec":  jax.random.uniform(ks[2], (decoder_dim, attention_dim), jnp.float32, -s_d, s_d),
        "b_dec":  jax.random.uniform(ks[3], (attention_dim,), jnp.float32, -s_d, s_d),
        "W_full": jax.random.uniform(ks[4], (attention_dim, 1), jnp.float32, -s_a, s_a),
        "b_full": jax.random.uniform(ks[5], (1,), jnp.float32, -s_a, s_a),
    }


def reference_forward(encoder_out, decoder_hidden, params):
    """Pure-JAX reference matching the PyTorch module semantics (f32)."""
    att1 = encoder_out @ params["W_enc"] + params["b_enc"]                 # (B, P, A)
    att2 = decoder_hidden @ params["W_dec"] + params["b_dec"]              # (B, A)
    h = jnp.maximum(att1 + att2[:, None, :], 0.0)                          # (B, P, A)
    att = (h @ params["W_full"] + params["b_full"])[..., 0]                # (B, P)
    alpha = jax.nn.softmax(att, axis=1)                                    # (B, P)
    awe = jnp.sum(encoder_out * alpha[..., None], axis=1)                  # (B, E)
    return awe, alpha


if __name__ == "__main__":
    B, P = 16, 16          # batch, num_pixels
    E, D, A = 32, 32, 32   # encoder_dim, decoder_dim, attention_dim

    key = jax.random.PRNGKey(0)
    k_enc, k_dec, k_par = jax.random.split(key, 3)

    encoder_out = jax.random.normal(k_enc, (B, P, E), jnp.float32)
    decoder_hidden = jax.random.normal(k_dec, (B, D), jnp.float32)
    params = init_params(k_par, E, D, A)

    awe_ref, alpha_ref = reference_forward(encoder_out, decoder_hidden, params)

    # 1) Exact-semantics path (f32 MXU operands): tight tolerances vs. reference.
    awe, alpha = new_attention_forward(encoder_out, decoder_hidden, params,
                                       compute_dtype=jnp.float32)
    jax.block_until_ready((awe, alpha))
    assert jnp.allclose(awe, awe_ref, atol=1e-4, rtol=1e-4)
    assert jnp.allclose(alpha, alpha_ref, atol=1e-4, rtol=1e-4)
    assert jnp.allclose(jnp.sum(alpha, axis=1), 1.0, atol=1e-5)

    # 2) Production path (default bf16 MXU operands, f32 accumulation/softmax):
    #    elementwise tolerance relaxed for bf16 operands; alpha still normalizes
    #    exactly since the softmax epilogue is f32.
    awe_bf, alpha_bf = new_attention_forward(encoder_out, decoder_hidden, params)
    jax.block_until_ready((awe_bf, alpha_bf))
    assert jnp.allclose(awe_bf, awe_ref, atol=1e-1, rtol=1e-1)
    assert jnp.allclose(alpha_bf, alpha_ref, atol=1e-1, rtol=1e-1)
    assert jnp.allclose(jnp.sum(alpha_bf, axis=1), 1.0, atol=1e-5)

    print("KERNEL_OK")
</pallas_src>

<mosaic_0001>
module attributes {stable_mosaic.version = 11 : i64} {
  func.func @kernel(%arg0: i32, %arg1: memref<16x16x32xf32, #tpu.memory_space<vmem>>, %arg2: memref<16x32xf32, #tpu.memory_space<vmem>>, %arg3: memref<32x32xf32, #tpu.memory_space<vmem>>, %arg4: memref<32x32xf32, #tpu.memory_space<vmem>>, %arg5: memref<1x32xf32, #tpu.memory_space<vmem>>, %arg6: memref<1x32xf32, #tpu.memory_space<vmem>>, %arg7: memref<1xf32, #tpu.memory_space<smem>>, %arg8: memref<16x1x32xf32, #tpu.memory_space<vmem>>, %arg9: memref<16x16xf32, #tpu.memory_space<vmem>>) attributes {dimension_semantics = [#tpu.dimension_semantics<parallel>], iteration_bounds = array<i64: 1>, scalar_prefetch = 0 : i64, scratch_operands = 0 : i64, tpu.core_type = #tpu.core_type<tc>, window_params = [{transform_indices = @transform_0, window_bounds = array<i64: 16, 16, 32>}, {transform_indices = @transform_1, window_bounds = array<i64: 16, 32>}, {pipeline_mode = #tpu.pipeline_mode<synchronous>, transform_indices = @transform_2, window_bounds = array<i64: 32, 32>}, {pipeline_mode = #tpu.pipeline_mode<synchronous>, transform_indices = @transform_3, window_bounds = array<i64: 32, 32>}, {pipeline_mode = #tpu.pipeline_mode<synchronous>, transform_indices = @transform_4, window_bounds = array<i64: 1, 32>}, {pipeline_mode = #tpu.pipeline_mode<synchronous>, transform_indices = @transform_5, window_bounds = array<i64: 1, 32>}, {transform_indices = @transform_6, window_bounds = array<i64: 1>}, {transform_indices = @transform_7, window_bounds = array<i64: 16, 1, 32>}, {transform_indices = @transform_8, window_bounds = array<i64: 16, 16>}]} {
    %c0 = arith.constant 0 : index
    %c0_0 = arith.constant 0 : index
    %c0_1 = arith.constant 0 : index
    %0 = vector.load %arg1[%c0, %c0_0, %c0_1] : memref<16x16x32xf32, #tpu.memory_space<vmem>>, vector<16x16x32xf32>
    %1 = vector.shape_cast %0 : vector<16x16x32xf32> to vector<256x32xf32>
    %c0_2 = arith.constant 0 : index
    %c0_3 = arith.constant 0 : index
    %2 = vector.load %arg3[%c0_2, %c0_3] : memref<32x32xf32, #tpu.memory_space<vmem>>, vector<32x32xf32>
    %cst = arith.constant dense<0.000000e+00> : vector<256x32xf32>
    %3 = tpu.matmul %1, %2, %cst {dimension_numbers = #tpu.dot_dimension_numbers<[1], [0], [0], [1], [0, 0, 1, 1], [], []>} : vector<256x32xf32>, vector<32x32xf32>, vector<256x32xf32> -> vector<256x32xf32>
    %c0_4 = arith.constant 0 : index
    %c0_5 = arith.constant 0 : index
    %4 = vector.load %arg2[%c0_4, %c0_5] : memref<16x32xf32, #tpu.memory_space<vmem>>, vector<16x32xf32>
    %c0_6 = arith.constant 0 : index
    %c0_7 = arith.constant 0 : index
    %5 = vector.load %arg4[%c0_6, %c0_7] : memref<32x32xf32, #tpu.memory_space<vmem>>, vector<32x32xf32>
    %cst_8 = arith.constant dense<0.000000e+00> : vector<16x32xf32>
    %6 = tpu.matmul %4, %5, %cst_8 {dimension_numbers = #tpu.dot_dimension_numbers<[1], [0], [0], [1], [0, 0, 1, 1], [], []>} : vector<16x32xf32>, vector<32x32xf32>, vector<16x32xf32> -> vector<16x32xf32>
    %c0_9 = arith.constant 0 : index
    %c0_10 = arith.constant 0 : index
    %7 = vector.load %arg6[%c0_9, %c0_10] : memref<1x32xf32, #tpu.memory_space<vmem>>, vector<1x32xf32>
    %8 = vector.broadcast %7 : vector<1x32xf32> to vector<16x32xf32>
    %9 = arith.addf %6, %8 : vector<16x32xf32>
    %10 = vector.shape_cast %3 : vector<256x32xf32> to vector<16x16x32xf32>
    %11 = vector.shape_cast %9 : vector<16x32xf32> to vector<16x1x32xf32>
    %12 = vector.broadcast %11 : vector<16x1x32xf32> to vector<16x16x32xf32>
    %13 = arith.addf %10, %12 : vector<16x16x32xf32>
    %cst_11 = arith.constant 0.000000e+00 : f32
    %14 = vector.broadcast %cst_11 : f32 to vector<16x16x32xf32>
    %15 = arith.maximumf %13, %14 : vector<16x16x32xf32>
    %c0_12 = arith.constant 0 : index
    %c0_13 = arith.constant 0 : index
    %16 = vector.load %arg5[%c0_12, %c0_13] : memref<1x32xf32, #tpu.memory_space<vmem>>, vector<1x32xf32>
    %17 = vector.shape_cast %16 : vector<1x32xf32> to vector<1x1x32xf32>
    %18 = vector.broadcast %17 : vector<1x1x32xf32> to vector<16x16x32xf32>
    %19 = arith.mulf %15, %18 : vector<16x16x32xf32>
    %cst_14 = arith.constant dense<0.000000e+00> : vector<16x16xf32>
    %20 = vector.multi_reduction <add>, %19, %cst_14 [2] : vector<16x16x32xf32> to vector<16x16xf32>
    %c0_15 = arith.constant 0 : index
    %21 = memref.load %arg7[%c0_15] : memref<1xf32, #tpu.memory_space<smem>>
    %22 = vector.broadcast %21 : f32 to vector<16x16xf32>
    %23 = arith.addf %20, %22 : vector<16x16xf32>
    %cst_16 = arith.constant dense<0xFF800000> : vector<16xf32>
    %24 = vector.multi_reduction <maximumf>, %23, %cst_16 [1] : vector<16x16xf32> to vector<16xf32>
    %25 = vector.shape_cast %24 : vector<16xf32> to vector<16x1xf32>
    %26 = vector.broadcast %25 : vector<16x1xf32> to vector<16x16xf32>
    %27 = arith.subf %23, %26 : vector<16x16xf32>
    %28 = math.exp %27 : vector<16x16xf32>
    %cst_17 = arith.constant dense<0.000000e+00> : vector<16xf32>
    %29 = vector.multi_reduction <add>, %28, %cst_17 [1] : vector<16x16xf32> to vector<16xf32>
    %30 = vector.shape_cast %29 : vector<16xf32> to vector<16x1xf32>
    %31 = tpu.reciprocal %30 : vector<16x1xf32> -> vector<16x1xf32>
    %32 = vector.broadcast %31 : vector<16x1xf32> to vector<16x16xf32>
    %33 = arith.mulf %28, %32 : vector<16x16xf32>
    %c0_18 = arith.constant 0 : index
    %c0_19 = arith.constant 0 : index
    %34 = vector.load %arg9[%c0_18, %c0_19] : memref<16x16xf32, #tpu.memory_space<vmem>>, vector<16x16xf32>
    tpu.vector_store %arg9[%c0_18, %c0_19], %33 {strides = array<i32>} : memref<16x16xf32, #tpu.memory_space<vmem>>, vector<16x16xf32>,
    %35 = vector.shape_cast %33 : vector<16x16xf32> to vector<16x1x16xf32>
    "tpu.trace_start"() <{level = 10 : i32, message = "bqp,bpe->bqe"}> : () -> ()
    %cst_20 = arith.constant dense<0.000000e+00> : vector<16x1x32xf32>
    %36 = tpu.matmul %35, %0, %cst_20 {dimension_numbers = #tpu.dot_dimension_numbers<[2], [1], [1], [2], [0, 0, 0, 1, 1, 2], [0], [0]>} : vector<16x1x16xf32>, vector<16x16x32xf32>, vector<16x1x32xf32> -> vector<16x1x32xf32>
    "tpu.trace_stop"() : () -> ()
    %c0_21 = arith.constant 0 : index
    %c0_22 = arith.constant 0 : index
    %c0_23 = arith.constant 0 : index
    %37 = vector.load %arg8[%c0_21, %c0_22, %c0_23] : memref<16x1x32xf32, #tpu.memory_space<vmem>>, vector<16x1x32xf32>
    tpu.vector_store %arg8[%c0_21, %c0_22, %c0_23], %36 {strides = array<i32>} : memref<16x1x32xf32, #tpu.memory_space<vmem>>, vector<16x1x32xf32>,
    return
  }
  func.func @transform_0(%arg0: i32) -> (i32, i32, i32) {
    %c0_i32 = arith.constant 0 : i32
    %c0_i32_0 = arith.constant 0 : i32
    %c0_i32_1 = arith.constant 0 : i32
    return %arg0, %c0_i32, %c0_i32_0 : i32, i32, i32
  }
  func.func @transform_1(%arg0: i32) -> (i32, i32) {
    %c0_i32 = arith.constant 0 : i32
    %c0_i32_0 = arith.constant 0 : i32
    return %arg0, %c0_i32 : i32, i32
  }
  func.func @transform_2(%arg0: i32) -> (i32, i32) {
    %c0_i32 = arith.constant 0 : i32
    %c0_i32_0 = arith.constant 0 : i32
    %c0_i32_1 = arith.constant 0 : i32
    return %c0_i32, %c0_i32_0 : i32, i32
  }
  func.func @transform_3(%arg0: i32) -> (i32, i32) {
    %c0_i32 = arith.constant 0 : i32
    %c0_i32_0 = arith.constant 0 : i32
    %c0_i32_1 = arith.constant 0 : i32
    return %c0_i32, %c0_i32_0 : i32, i32
  }
  func.func @transform_4(%arg0: i32) -> (i32, i32) {
    %c0_i32 = arith.constant 0 : i32
    %c0_i32_0 = arith.constant 0 : i32
    %c0_i32_1 = arith.constant 0 : i32
    return %c0_i32, %c0_i32_0 : i32, i32
  }
  func.func @transform_5(%arg0: i32) -> (i32, i32) {
    %c0_i32 = arith.constant 0 : i32
    %c0_i32_0 = arith.constant 0 : i32
    %c0_i32_1 = arith.constant 0 : i32
    return %c0_i32, %c0_i32_0 : i32, i32
  }
  func.func @transform_6(%arg0: i32) -> i32 {
    %c0_i32 = arith.constant 0 : i32
    %c0_i32_0 = arith.constant 0 : i32
    return %c0_i32 : i32
  }
  func.func @transform_7(%arg0: i32) -> (i32, i32, i32) {
    %c0_i32 = arith.constant 0 : i32
    %c0_i32_0 = arith.constant 0 : i32
    %c0_i32_1 = arith.constant 0 : i32
    return %arg0, %c0_i32, %c0_i32_0 : i32, i32, i32
  }
  func.func @transform_8(%arg0: i32) -> (i32, i32) {
    %c0_i32 = arith.constant 0 : i32
    %c0_i32_0 = arith.constant 0 : i32
    return %arg0, %c0_i32 : i32, i32
  }
}

</mosaic_0001>

<bundles_post_ra>
// kernel: tpu_custom_call.1
= control target key start
LH: loop header
LB: loop body
LE: loop exit
PB: predicated region body
PF: predicated region fallthrough
CT: control target
= control target key end

     0   :  { %15 = vsyncpa [#allocation4], 0  ;;  %s5072_s0 = inlined_call_operand.hbm [shape: f32[16,16,32], index: 0, kind: input, shape index: {}]   ;;  %s5073_s1 = inlined_call_operand.hbm [shape: f32[16,32], index: 1, kind: input, shape index: {}]   ;;  %s5074_s2 = inlined_call_operand.hbm [shape: f32[32,32], index: 2, kind: input, shape index: {}]   ;;  %s5075_s3 = inlined_call_operand.hbm [shape: f32[32,32], index: 3, kind: input, shape index: {}]   ;;  %s5076_s4 = inlined_call_operand.hbm [shape: f32[1,32], index: 4, kind: input, shape index: {}]   ;;  %s5077_s5 = inlined_call_operand.hbm [shape: f32[1,32], index: 5, kind: input, shape index: {}]   ;;  %s5078_s6 = inlined_call_operand.<no memory space> [shape: f32[1], index: 6, kind: input, shape index: {}]   ;;  %s5079_s7 = inlined_call_operand.hbm [shape: f32[16,1,32], index: 7, kind: output, shape index: {0}]   ;;  %s5080_s8 = inlined_call_operand.hbm [shape: f32[16,16], index: 8, kind: output, shape index: {1}]  }
   0x1   :  { %16 = vsyncpa [#allocation7], 0 }
   0x2   :  { %17 = vsyncpa [#allocation10], 0 }
   0x3   :  { %18 = vsyncpa [#allocation13], 0 }
   0x4   :  { %19 = vsyncpa [#allocation5], 0 }
   0x5   :  { %20 = vsyncpa [#allocation16], 0  ;;  %s3927_s27 = smov [#allocation6]   ;;  %s3928_s29 = smov [#allocation9]  }
   0x6   :  { %s38_s28 = sshll.u32 %s3927_s27, 4  ;;  %s62_s30 = sshll.u32 %s3928_s29, 4  ;;  %s39_s28 = int_to_ptr.vmem [resolvable:$true] %s38_s28  ;;  %s3989_s30 = int_to_ptr.vmem [resolvable:$true] %s62_s30 }
   0x7   :  { %s3739_s11 = scalar_lea.hbm %s5073_s1, 256 }
   0x8   :  { %p3740_p0 = scmp.ne.s32.totalorder %s5073_s1, %s3739_s11  ;;  %p3743_p1 = scmp.lt.u32.totalorder %s3739_s11, %s5073_s1 }
   0xa   :  { %p3745_p2 = pnand %p3743_p1, %p3740_p0 }
   0xc   :  { %3748 = shalt.err (!%p3745_p2)
}
   0xd   :  { %s3749_s16 = scalar_lea.vmem %s39_s28, 256  ;;  %p3754_p4 = scmp.lt.s32.totalorder %s39_s28, %s39_s28 }
   0xe   :  { %p3750_p3 = scmp.ne.s32.totalorder %s39_s28, %s3749_s16  ;;  %p3755_p5 = scmp.lt.s32.totalorder %s3749_s16, %s3749_s16 }
  0x10   :  { %p3756_p6 = por %p3755_p5, %p3754_p4 }
  0x12   :  { %p3757_p7 = pnand %p3756_p6, %p3750_p3 }
  0x14   :  { %3760 = shalt.err (!%p3757_p7)
}
  0x15   :  { %s3929_s17 = smov 128   ;;  %s3930_s18 = smov 8  }
  0x16   :  { %44 = dma.hbm_to_vmem [thread:$0]  %s5073_s1, 256, %s39_s28, [#allocation7], %s3929_s17, %s3929_s17, %s3930_s18  }
  0x17   :  { %s3761_s23 = scalar_lea.hbm %s5075_s3, 512 }
  0x18   :  { %p3762_p8 = scmp.ne.s32.totalorder %s5075_s3, %s3761_s23  ;;  %p3765_p9 = scmp.lt.u32.totalorder %s3761_s23, %s5075_s3 }
  0x1a   :  { %p3767_p10 = pnand %p3765_p9, %p3762_p8 }
  0x1c   :  { %3770 = shalt.err (!%p3767_p10)
}
  0x1d   :  { %s3771_s29 = scalar_lea.vmem %s3989_s30, 512  ;;  %p3776_p12 = scmp.lt.s32.totalorder %s3989_s30, %s3989_s30 }
  0x1e   :  { %p3772_p11 = scmp.ne.s32.totalorder %s3989_s30, %s3771_s29  ;;  %p3777_p13 = scmp.lt.s32.totalorder %s3771_s29, %s3771_s29 }
  0x20   :  { %p3778_p0 = por %p3777_p13, %p3776_p12 }
  0x22   :  { %p3779_p1 = pnand %p3778_p0, %p3772_p11 }
  0x24   :  { %3782 = shalt.err (!%p3779_p1)
}
  0x25   :  { %68 = dma.hbm_to_vmem [thread:$0]  %s5075_s3, 512, %s3989_s30, [#allocation10], %s3929_s17, %s3929_s17, %s3930_s18  }
  0x26   :  { %s3931_s9 = smov [#allocation3]   ;;  %s3932_s11 = smov [#allocation8]  }
  0x27   :  { %s26_s10 = sshll.u32 %s3931_s9, 4  ;;  %s50_s12 = sshll.u32 %s3932_s11, 4  ;;  %s27_s10 = int_to_ptr.vmem [resolvable:$true] %s26_s10  ;;  %s4026_s12 = int_to_ptr.vmem [resolvable:$true] %s50_s12 }
  0x28   :  { %s3783_s15 = scalar_lea.hbm %s5072_s0, 4096 }
  0x29   :  { %p3784_p2 = scmp.ne.s32.totalorder %s5072_s0, %s3783_s15  ;;  %p3787_p3 = scmp.lt.u32.totalorder %s3783_s15, %s5072_s0 }
  0x2b   :  { %p3789_p4 = pnand %p3787_p3, %p3784_p2 }
  0x2d   :  { %3792 = shalt.err (!%p3789_p4)
}
  0x2e   :  { %s3793_s3 = scalar_lea.vmem %s27_s10, 4096  ;;  %p3798_p6 = scmp.lt.s32.totalorder %s27_s10, %s27_s10 }
  0x2f   :  { %p3794_p5 = scmp.ne.s32.totalorder %s27_s10, %s3793_s3  ;;  %p3799_p7 = scmp.lt.s32.totalorder %s3793_s3, %s3793_s3 }
  0x31   :  { %p3800_p8 = por %p3799_p7, %p3798_p6 }
  0x33   :  { %p3801_p9 = pnand %p3800_p8, %p3794_p5 }
  0x35   :  { %3804 = shalt.err (!%p3801_p9)
}
  0x36   :  { %32 = dma.hbm_to_vmem [thread:$0]  %s5072_s0, 4096, %s27_s10, [#allocation4], %s3929_s17, %s3929_s17, %s3930_s18  }
  0x37   :  { %s3805_s25 = scalar_lea.hbm %s5074_s2, 512 }
  0x38   :  { %p3806_p10 = scmp.ne.s32.totalorder %s5074_s2, %s3805_s25  ;;  %p3809_p11 = scmp.lt.u32.totalorder %s3805_s25, %s5074_s2 }
  0x3a   :  { %p3811_p12 = pnand %p3809_p11, %p3806_p10 }
  0x3c   :  { %3814 = shalt.err (!%p3811_p12)
}
  0x3d   :  { %s3815_s28 = scalar_lea.vmem %s4026_s12, 512  ;;  %p3820_p0 = scmp.lt.s32.totalorder %s4026_s12, %s4026_s12 }
  0x3e   :  { %p3816_p13 = scmp.ne.s32.totalorder %s4026_s12, %s3815_s28  ;;  %p3821_p1 = scmp.lt.s32.totalorder %s3815_s28, %s3815_s28 }
  0x40   :  { %p3822_p2 = por %p3821_p1, %p3820_p0 }
  0x42   :  { %p3823_p3 = pnand %p3822_p2, %p3816_p13 }
  0x44   :  { %3826 = shalt.err (!%p3823_p3)
}
  0x45   :  { %56 = dma.hbm_to_vmem [thread:$0]  %s5074_s2, 512, %s4026_s12, [#allocation7], %s3929_s17, %s3929_s17, %s3930_s18  }
  0x46   :  { %s3933_s10 = smov [#allocation11]   ;;  %s3934_s13 = smov [#allocation12]  }
  0x47   :  { %s75_s11 = sshll.u32 %s3933_s10, 4  ;;  %s85_s14 = sshll.u32 %s3934_s13, 4  ;;  %s76_s11 = int_to_ptr.vmem [resolvable:$true] %s75_s11  ;;  %s86_s14 = int_to_ptr.vmem [resolvable:$true] %s85_s14 }
  0x48   :  { %s3827_s19 = scalar_lea.hbm %s5076_s4, 16 }
  0x49   :  { %p3828_p4 = scmp.ne.s32.totalorder %s5076_s4, %s3827_s19  ;;  %p3831_p5 = scmp.lt.u32.totalorder %s3827_s19, %s5076_s4 }
  0x4b   :  { %p3833_p6 = pnand %p3831_p5, %p3828_p4 }
  0x4d   :  { %3836 = shalt.err (!%p3833_p6)
}
  0x4e   :  { %s3837_s2 = scalar_lea.vmem %s76_s11, 16  ;;  %s3841_s12 = scalar_lea.vmem %s76_s11, 32 }
  0x4f   :  { %p3838_p7 = scmp.ne.s32.totalorder %s76_s11, %s3837_s2  ;;  %p3842_p8 = scmp.lt.s32.totalorder %s76_s11, %s76_s11 }
  0x50   :  { %p3843_p9 = scmp.lt.s32.totalorder %s3841_s12, %s3837_s2 }
  0x52   :  { %p3844_p10 = por %p3843_p9, %p3842_p8 }
  0x54   :  { %p3845_p11 = pnand %p3844_p10, %p3838_p7 }
  0x56   :  { %3848 = shalt.err (!%p3845_p11)
}
  0x57   :  { %78 = dma.hbm_to_vmem [thread:$0]  %s5076_s4, 16, %s76_s11, [#allocation10]  }
  0x58   :  { %s3849_s26 = scalar_lea.hbm %s5077_s5, 16 }
  0x59   :  { %p3850_p12 = scmp.ne.s32.totalorder %s5077_s5, %s3849_s26  ;;  %p3853_p13 = scmp.lt.u32.totalorder %s3849_s26, %s5077_s5 }
  0x5b   :  { %p3855_p0 = pnand %p3853_p13, %p3850_p12 }
  0x5d   :  { %3858 = shalt.err (!%p3855_p0)
}
  0x5e   :  { %s3859_s0 = scalar_lea.vmem %s86_s14, 16  ;;  %s3863_s9 = scalar_lea.vmem %s86_s14, 32 }
  0x5f   :  { %p3860_p1 = scmp.ne.s32.totalorder %s86_s14, %s3859_s0  ;;  %p3864_p2 = scmp.lt.s32.totalorder %s86_s14, %s86_s14 }
  0x60   :  { %p3865_p3 = scmp.lt.s32.totalorder %s3863_s9, %s3859_s0 }
  0x62   :  { %p3866_p4 = por %p3865_p3, %p3864_p2 }
  0x64   :  { %p3867_p5 = pnand %p3866_p4, %p3860_p1 }
  0x66   :  { %3870 = shalt.err (!%p3867_p5)
}
  0x67   :  { %88 = dma.hbm_to_vmem [thread:$0]  %s5077_s5, 16, %s86_s14, [#allocation13]  }
  0x68   :  { %3915 = dma.done.wait [#allocation4], 4096  }
  0x69   :  { %3916 = vsyncadd [#allocation4], 4294963200 }
  0x6a   :  { %3917 = dma.done.wait [#allocation7], 768  }
  0x6b   :  { %3918 = vsyncadd [#allocation7], 4294966528 }
  0x6c   :  { %3919 = dma.done.wait [#allocation10], 528  }
  0x6d   :  { %3920 = vsyncadd [#allocation10], 4294966768 }
  0x6e   :  { %3921 = dma.done.wait [#allocation13], 16  }
  0x6f   :  { %3922 = vsyncadd [#allocation13], 4294967280  ;;  %v141_v0 = vld [vmem:[#allocation8] sm:$0xff]  ;;  %v142_v1 = vld [vmem:[#allocation8 + $0x8] sm:$0xff]  ;;  %vm145_vm0 = vcmask 261120   ;;  %vm1017_vm1 = vcmask 130112  }
  0x70   :  { %v469_v2 = vld [vmem:[#allocation9] sm:$0xff]  ;;  %v3588_v3 = vpack.c.bf16 %v142_v1, %v141_v0  ;;  %v470_v4 = vld [vmem:[#allocation9 + $0x8] sm:$0xff]  ;;  %v143_v5 = vld [vmem:[#allocation8 + $0x10] sm:$0xff]  ;;  %v3935_v62 = vmov 1966171168   ;;  %v5081_v0 = vlaneseq  ;;  %vm1154_vm2 = vcmask 1041409  }
  0x71   :  { %v144_v6 = vld [vmem:[#allocation8 + $0x18] sm:$0xff]  ;;  %v3596_v7 = vpack.c.bf16 %v470_v4, %v469_v2  ;;  %v471_v9 = vld [vmem:[#allocation9 + $0x10] sm:$0xff]  ;;  %v4095_v16 = vld [vmem:[#allocation3 + $0x10] sm:$0xff]  ;;  %v565_v63 = vunpack.c.l.s4 %v3935_v62  ;;  %vm1156_vm3 = vcmask 1042434   ;;  %vm1158_vm4 = vcmask 1043459  }
  0x72   :  { %v3592_v8 = vpack.c.bf16 %v144_v6, %v143_v5  ;;  %v472_v10 = vld [vmem:[#allocation9 + $0x18] sm:$0xff]  ;;  %v4087_v11 = vld [vmem:[#allocation3] sm:$0xff]  ;;  %3589 = vmatprep.subr.bf16.mxu0 %v3588_v3  ;;  %5118 = vst [vmem:[#allocation23_spill] sm:$0xff] %v4095_v16  ;;  %v4097_v17 = vld [vmem:[#allocation3 + $0x18] sm:$0xff]  ;;  %v4250_v2 = vshrl.u32 %v5081_v0, 7  ;;  %vm1160_vm5 = vcmask 1044484  }
  0x73   :  { %v3600_v12 = vpack.c.bf16 %v472_v10, %v471_v9  ;;  %v4089_v13 = vld [vmem:[#allocation3 + $0x8] sm:$0xff]  ;;  %3417 = vmatprep.mubr.msk.f32.mxu0 %vm145_vm0, %v4087_v11  ;;  %v467_v14 = vld [vmem:[#allocation6] sm:$0xff]  ;;  %3597 = vmatprep.subr.bf16.mxu1 %v3596_v7  ;;  %5119 = vst [vmem:[#allocation24_spill] sm:$0xff] %v4097_v17  ;;  %v4105_v21 = vld [vmem:[#allocation3 + $0x30] sm:$0xff]  ;;  %v566_v1 = vunpack.c.0.s8 %v565_v63  ;;  %vm1162_vm6 = vcmask 1045509   ;;  %vm1164_vm7 = vcmask 1046534  }
  0x74   :  { %3591 = vmatpush3.bf16.msra.mxu0 %v3588_v3  ;;  %v4099_v18 = vld [vmem:[#allocation3 + $0x20] sm:$0xff]  ;;  %3599 = vmatpush3.bf16.msra.mxu1 %v3596_v7  ;;  %v4103_v20 = vld [vmem:[#allocation3 + $0x28] sm:$0xff]  ;;  %5122 = vst [vmem:[#allocation27_spill] sm:$0xff] %v4105_v21  ;;  %v4107_v22 = vld [vmem:[#allocation3 + $0x38] sm:$0xff]  ;;  %vm1166_vm8 = vcmask 1047559   ;;  %vm1177_vm9 = vcmask 130048  }
  0x75   :  { %5120 = vst [vmem:[#allocation25_spill] sm:$0xff] %v4099_v18  ;;  %3593 = vmatprep.subr.bf16.mxu0 %v3592_v8  ;;  %5121 = vst [vmem:[#allocation26_spill] sm:$0xff] %v4103_v20  ;;  %3601 = vmatprep.subr.bf16.mxu1 %v3600_v12  ;;  %v4114_v25 = vld [vmem:[#allocation3 + $0x40] sm:$0xff]  ;;  %v4116_v26 = vld [vmem:[#allocation3 + $0x48] sm:$0xff]  ;;  %v4253_v6 = vsub.s32 %v566_v1, %v4250_v2  ;;  %vm3938_vm10 = vmmov 0  }
  0x76   :  { %5123 = vst [vmem:[#allocation28_spill] sm:$0xff] %v4107_v22  ;;  %3473 = vmatprep.mubr.msk.f32.mxu1 %vm145_vm0, %v467_v14  ;;  %5124 = vst [vmem:[#allocation29_spill] sm:$0xff] %v4114_v25  ;;  %v4118_v27 = vld [vmem:[#allocation3 + $0x50] sm:$0xff]  ;;  %v468_v28 = vld [vmem:[#allocation6 + $0x8] sm:$0xff] }
  0x77   :  { %5125 = vst [vmem:[#allocation30_spill] sm:$0xff] %v4116_v26  ;;  %5126 = vst [vmem:[#allocation31_spill] sm:$0xff] %v4118_v27  ;;  %v4122_v30 = vld [vmem:[#allocation3 + $0x58] sm:$0xff]  ;;  %v4124_v31 = vld [vmem:[#allocation3 + $0x60] sm:$0xff] }
  0x78   :  { %5127 = vst [vmem:[#allocation32_spill] sm:$0xff] %v4122_v30  ;;  %5128 = vst [vmem:[#allocation33_spill] sm:$0xff] %v4124_v31  ;;  %v4126_v32 = vld [vmem:[#allocation3 + $0x68] sm:$0xff]  ;;  %3595 = vmatpush3.bf16.msra.mxu0 %v3592_v8  ;;  %v4132_v35 = vld [vmem:[#allocation3 + $0x70] sm:$0xff]  ;;  %3603 = vmatpush3.bf16.msra.mxu1 %v3600_v12 }
  0x79   :  { %5129 = vst [vmem:[#allocation34_spill] sm:$0xff] %v4126_v32  ;;  %5130 = vst [vmem:[#allocation35_spill] sm:$0xff] %v4132_v35  ;;  %v4134_v36 = vld [vmem:[#allocation3 + $0x78] sm:$0xff]  ;;  %v4136_v37 = vld [vmem:[#allocation3 + $0x80] sm:$0xff] }
  0x7a   :  { %5131 = vst [vmem:[#allocation36_spill] sm:$0xff] %v4134_v36  ;;  %5132 = vst [vmem:[#allocation37_spill] sm:$0xff] %v4136_v37  ;;  %v4140_v39 = vld [vmem:[#allocation3 + $0x88] sm:$0xff]  ;;  %v4142_v40 = vld [vmem:[#allocation3 + $0x90] sm:$0xff] }
  0x7b   :  { %5133 = vst [vmem:[#allocation38_spill] sm:$0xff] %v4140_v39  ;;  %5134 = vst [vmem:[#allocation39_spill] sm:$0xff] %v4142_v40  ;;  %v4144_v41 = vld [vmem:[#allocation3 + $0x98] sm:$0xff]  ;;  %v4150_v44 = vld [vmem:[#allocation3 + $0xa0] sm:$0xff]  ;;  %3418 = vmatmul.mubr.msk.f32.vlgmr.msra.gmra.mrb[0].mxu0 %vm145_vm0, %v4089_v13  ;;  %3474 = vmatmul.mubr.msk.f32.vlgmr.msra.gmra.mrb[0].mxu1 %vm145_vm0, %v468_v28  ;;  %v4257_v28 = vsub.s32 0, %v4250_v2 }
  0x7c   :  { %5135 = vst [vmem:[#allocation40_spill] sm:$0xff] %v4144_v41  ;;  %5136 = vst [vmem:[#allocation41_spill] sm:$0xff] %v4150_v44  ;;  %v4152_v45 = vld [vmem:[#allocation3 + $0xa8] sm:$0xff]  ;;  %v4154_v46 = vld [vmem:[#allocation3 + $0xb0] sm:$0xff]  ;;  %3420 = vmatprep.mubr.msk.f32.mxu0 %vm145_vm0, %v4095_v16 }
  0x7d   :  { %5137 = vst [vmem:[#allocation42_spill] sm:$0xff] %v4152_v45  ;;  %5138 = vst [vmem:[#allocation43_spill] sm:$0xff] %v4154_v46  ;;  %v4160_v48 = vld [vmem:[#allocation3 + $0xb8] sm:$0xff]  ;;  %v4162_v49 = vld [vmem:[#allocation3 + $0xc0] sm:$0xff] }
  0x7e   :  { %5139 = vst [vmem:[#allocation44_spill] sm:$0xff] %v4160_v48  ;;  %5140 = vst [vmem:[#allocation45_spill] sm:$0xff] %v4162_v49  ;;  %v4164_v50 = vld [vmem:[#allocation3 + $0xc8] sm:$0xff]  ;;  %v4173_v53 = vld [vmem:[#allocation3 + $0xd0] sm:$0xff] }
  0x7f   :  { %5141 = vst [vmem:[#allocation46_spill] sm:$0xff] %v4164_v50  ;;  %5142 = vst [vmem:[#allocation47_spill] sm:$0xff] %v4173_v53  ;;  %v4175_v54 = vld [vmem:[#allocation3 + $0xd8] sm:$0xff]  ;;  %v4177_v55 = vld [vmem:[#allocation3 + $0xe0] sm:$0xff]  ;;  %3421 = vmatmul.mubr.msk.f32.gmra.mrb[2].mxu0 %vm145_vm0, %v4097_v17 }
  0x80   :  { %5143 = vst [vmem:[#allocation48_spill] sm:$0xff] %v4175_v54  ;;  %5144 = vst [vmem:[#allocation49_spill] sm:$0xff] %v4177_v55  ;;  %v4181_v57 = vld [vmem:[#allocation3 + $0xe8] sm:$0xff]  ;;  %v4183_v58 = vld [vmem:[#allocation3 + $0xf0] sm:$0xff]  ;;  %3423 = vmatprep.mubr.msk.f32.mxu0 %vm145_vm0, %v4099_v18 }
  0x81   :  { %5145 = vst [vmem:[#allocation50_spill] sm:$0xff] %v4181_v57  ;;  %v4185_v59 = vld [vmem:[#allocation3 + $0xf8] sm:$0xff]  ;;  %v3299_v3 = vld [vmem:[#allocation12] ss:$0 sm:$0xff]  ;;  %v4266_v24 = vld [vmem:[#allocation11] ss:$0 sm:$0xff] }
  0x83   :  { %3424 = vmatmul.mubr.msk.f32.gmra.mrb[4].mxu0 %vm145_vm0, %v4103_v20 }
  0x84   :  { %3426 = vmatprep.mubr.msk.f32.mxu0 %vm145_vm0, %v4105_v21 }
  0x87   :  { %3427 = vmatmul.mubr.msk.f32.gmra.mrb[6].mxu0 %vm145_vm0, %v4107_v22 }
  0x88   :  { %3429 = vmatprep.mubr.msk.f32.mxu0 %vm145_vm0, %v4114_v25 }
  0x8b   :  { %3430 = vmatmul.mubr.msk.f32.gmra.mrb[8].mxu0 %vm145_vm0, %v4116_v26 }
  0x8c   :  { %3432 = vmatprep.mubr.msk.f32.mxu0 %vm145_vm0, %v4118_v27 }
  0x8f   :  { %3433 = vmatmul.mubr.msk.f32.gmra.mrb[10].mxu0 %vm145_vm0, %v4122_v30 }
  0x90   :  { %3435 = vmatprep.mubr.msk.f32.mxu0 %vm145_vm0, %v4124_v31 }
  0x93   :  { %3436 = vmatmul.mubr.msk.f32.gmra.mrb[12].mxu0 %vm145_vm0, %v4126_v32 }
  0x94   :  { %3438 = vmatprep.mubr.msk.f32.mxu0 %vm145_vm0, %v4132_v35 }
  0x97   :  { %3439 = vmatmul.mubr.msk.f32.gmra.mrb[14].mxu0 %vm145_vm0, %v4134_v36 }
  0x98   :  { %3441 = vmatprep.mubr.msk.f32.mxu0 %vm145_vm0, %v4136_v37 }
  0x9b   :  { %3442 = vmatmul.mubr.msk.f32.gmra.mrb[16].mxu0 %vm145_vm0, %v4140_v39 }
  0x9c   :  { %3444 = vmatprep.mubr.msk.f32.mxu0 %vm145_vm0, %v4142_v40 }
  0x9f   :  { %3445 = vmatmul.mubr.msk.f32.gmra.mrb[18].mxu0 %vm145_vm0, %v4144_v41 }
  0xa0   :  { %3447 = vmatprep.mubr.msk.f32.mxu0 %vm145_vm0, %v4150_v44 }
  0xa3   :  { %3448 = vmatmul.mubr.msk.f32.gmra.mrb[20].mxu0 %vm145_vm0, %v4152_v45 }
  0xa4   :  { %3450 = vmatprep.mubr.msk.f32.mxu0 %vm145_vm0, %v4154_v46 }
  0xa7   :  { %3451 = vmatmul.mubr.msk.f32.gmra.mrb[22].mxu0 %vm145_vm0, %v4160_v48 }
  0xa8   :  { %3453 = vmatprep.mubr.msk.f32.mxu0 %vm145_vm0, %v4162_v49 }
  0xab   :  { %3454 = vmatmul.mubr.msk.f32.gmra.mrb[24].mxu0 %vm145_vm0, %v4164_v50 }
  0xac   :  { %3456 = vmatprep.mubr.msk.f32.mxu0 %vm145_vm0, %v4173_v53 }
  0xaf   :  { %3457 = vmatmul.mubr.msk.f32.gmra.mrb[26].mxu0 %vm145_vm0, %v4175_v54 }
  0xb0   :  { %3459 = vmatprep.mubr.msk.f32.mxu0 %vm145_vm0, %v4177_v55 }
  0xb3   :  { %3460 = vmatmul.mubr.msk.f32.gmra.mrb[28].mxu0 %vm145_vm0, %v4181_v57 }
  0xb4   :  { %3462 = vmatprep.mubr.msk.f32.mxu0 %vm145_vm0, %v4183_v58 }
  0xb7   :  { %3463 = vmatmul.mubr.msk.f32.gmra.mrb[30].mxu0 %vm145_vm0, %v4185_v59 }
 0x14e   :  { %v3419_v4 = vpop.f32.mrb[0].mxu0  ;;  %v3475_v5 = vpop.f32.mrb[0].mxu1 }
 0x14f   :  { %v308_v7 = vpop.f32.mrb[1].mxu0  ;;  %v552_v8 = vpop.f32.mrb[1].mxu1 }
 0x150   :  { %v553_v9 = vadd.f32 %v3299_v3, %v552_v8 }
 0x152   :  { %v3422_v10 = vpop.f32.mrb[2].mxu0  ;;  %v563_v12 = vcombine.high %v553_v9, %v553_v9  ;;  %v570_v14 = vrot.slane %v553_v9, %v4253_v6 }
 0x153   :  { %v318_v62 = vpop.f32.mrb[3].mxu0 }
 0x154   :  { %v577_v63 = vrot.slane %v563_v12, %v4253_v6  ;;  %v578_v60 = vcombine.high %v570_v14, %v570_v14  ;;  %v586_v56 = vrot.slane %v570_v14, %v4253_v6 }
 0x156   :  { %v3425_v52 = vpop.f32.mrb[4].mxu0  ;;  %v664_v1 = vrot.slane %v586_v56, %v4257_v28  ;;  %v600_v51 = vrot.slane %v578_v60, %v4253_v6  ;;  %v608_v47 = vcombine.high %v586_v56, %v586_v56  ;;  %v593_v43 = vrot.slane %v577_v63, %v4253_v6 }
 0x157   :  { %v328_v8 = vpop.f32.mrb[5].mxu0  ;;  %v579_v42 = vcombine.high %v577_v63, %v577_v63 }
 0x158   :  { %v742_v9 = vadd.f32 %v3419_v4, %v664_v1  ;;  %v741_v38 = vadd.f32 %v664_v1, %v308_v7  ;;  %v668_v34 = vrot.slane %v600_v51, %v4257_v28  ;;  %v672_v33 = vrot.slane %v608_v47, %v4257_v28 }
 0x159   :  { %v610_v29 = vcombine.high %v600_v51, %v600_v51  ;;  %v680_v4 = vrot.slane %v593_v43, %v4257_v28  ;;  %v607_v47 = vrot.slane %v579_v42, %v4253_v6 }
 0x15a   :  { %v3428_v12 = vpop.f32.mrb[6].mxu0  ;;  %v774_v14 = vmax.f32 %v742_v9, 0.0  ;;  %v773_v23 = vmax.f32 %v741_v38, 0.0  ;;  %v744_v19 = vadd.f32 %v3422_v10, %v668_v34  ;;  %v743_v15 = vadd.f32 %v668_v34, %v318_v62 }
 0x15b   :  { %v338_v60 = vpop.f32.mrb[7].mxu0  ;;  %v746_v56 = vadd.f32 %v3425_v52, %v672_v33  ;;  %v745_v61 = vadd.f32 %v672_v33, %v328_v8  ;;  %v676_v0 = vrot.slane %v610_v29, %v4257_v28  ;;  %v4275_v62 = vadd.f32 %v3475_v5, %v3299_v3 }
 0x15c   :  { %v776_v7 = vmax.f32 %v744_v19, 0.0  ;;  %v775_v63 = vmax.f32 %v743_v15, 0.0  ;;  %v812_v1 = vmul.f32 %v4266_v24, %v773_v23  ;;  %v813_v38 = vmul.f32 %v4266_v24, %v774_v14 }
 0x15d   :  { %v748_v51 = vadd.f32 %v3428_v12, %v676_v0  ;;  %v747_v55 = vadd.f32 %v676_v0, %v338_v60  ;;  %v777_v10 = vmax.f32 %v745_v61, 0.0  ;;  %v609_v19 = vcombine.high %v593_v43, %v593_v43 }
 0x15e   :  { %v3431_v57 = vpop.f32.mrb[8].mxu0  ;;  %v844_v52 = vsel %vm145_vm0, %v812_v1, 0.0  ;;  %v814_v29 = vmul.f32 %v4266_v24, %v775_v63  ;;  %v778_v23 = vmax.f32 %v746_v56, 0.0  ;;  %v684_v0 = vrot.slane %v607_v47, %v4257_v28 }
 0x15f   :  { %v750_v34 = vadd.f32 %v3431_v57, %v680_v4  ;;  %v348_v33 = vpop.f32.mrb[9].mxu0  ;;  %845 = vadd.xlane.f32.xlu0 %v844_v52  ;;  %v815_v8 = vmul.f32 %v4266_v24, %v776_v7  ;;  %v779_v57 = vmax.f32 %v747_v55, 0.0  ;;  %v847_v12 = vsel %vm145_vm0, %v813_v38, 0.0 }
 0x160   :  { %v749_v15 = vadd.f32 %v680_v4, %v348_v33  ;;  %v850_v42 = vsel %vm145_vm0, %v814_v29, 0.0  ;;  %v816_v3 = vmul.f32 %v4266_v24, %v777_v10  ;;  %v619_v5 = vrot.slane %v4275_v62, %v4253_v6 }
 0x161   :  { %851 = vadd.xlane.f32.xlu1 %v850_v42  ;;  %v780_v43 = vmax.f32 %v748_v51, 0.0  ;;  %v853_v56 = vsel %vm145_vm0, %v815_v8, 0.0  ;;  %v688_v4 = vrot.slane %v609_v19, %v4257_v28  ;;  %v817_v7 = vmul.f32 %v4266_v24, %v778_v23 }
 0x162   :  { %v3434_v61 = vpop.f32.mrb[10].mxu0  ;;  %v611_v63 = vcombine.high %v607_v47, %v607_v47  ;;  %v781_v1 = vmax.f32 %v749_v15, 0.0  ;;  %v856_v52 = vsel %vm145_vm0, %v816_v3, 0.0  ;;  %v818_v33 = vmul.f32 %v4266_v24, %v779_v57 }
 0x163   :  { %v752_v9 = vadd.f32 %v3434_v61, %v684_v0  ;;  %v358_v14 = vpop.f32.mrb[11].mxu0  ;;  %848 = vadd.xlane.f32.xlu0 %v847_v12  ;;  %v627_v29 = vcombine.high %v619_v5, %v619_v5  ;;  %v635_v42 = vrot.slane %v619_v5, %v4253_v6  ;;  %v859_v19 = vsel %vm145_vm0, %v817_v7, 0.0 }
 0x164   :  { %v751_v60 = vadd.f32 %v684_v0, %v358_v14  ;;  %v782_v0 = vmax.f32 %v750_v34, 0.0  ;;  %v692_v23 = vrot.slane %v611_v63, %v4257_v28  ;;  %v819_v47 = vmul.f32 %v4266_v24, %v780_v43 }
 0x165   :  { %854 = vadd.xlane.f32.xlu1 %v853_v56  ;;  %v862_v12 = vsel %vm145_vm0, %v818_v33, 0.0  ;;  %v820_v57 = vmul.f32 %v4266_v24, %v781_v1  ;;  %v696_v5 = vrot.slane %v635_v42, %v4257_v28  ;;  %v784_v34 = vmax.f32 %v752_v9, 0.0 }
 0x166   :  { %v3437_v55 = vpop.f32.mrb[12].mxu0  ;;  %v783_v8 = vmax.f32 %v751_v60, 0.0  ;;  %v865_v56 = vsel %vm145_vm0, %v819_v47, 0.0  ;;  %v649_v43 = vrot.slane %v627_v29, %v4253_v6  ;;  %v657_v33 = vcombine.high %v635_v42, %v635_v42 }
 0x167   :  { %v754_v38 = vadd.f32 %v3437_v55, %v688_v4  ;;  %v368_v10 = vpop.f32.mrb[13].mxu0  ;;  %857 = vadd.xlane.f32.xlu0 %v856_v52  ;;  %v868_v55 = vsel %vm145_vm0, %v820_v57, 0.0 }
 0x168   :  { %v753_v51 = vadd.f32 %v688_v4, %v368_v10  ;;  %v821_v4 = vmul.f32 %v4266_v24, %v782_v0  ;;  %v822_v1 = vmul.f32 %v4266_v24, %v783_v8  ;;  %v612_v10 = vcombine.high %v4275_v62, %v4275_v62 }
 0x169   :  { %860 = vadd.xlane.f32.xlu1 %v859_v19  ;;  %v786_v19 = vmax.f32 %v754_v38, 0.0  ;;  %v700_v29 = vrot.slane %v649_v43, %v4257_v28  ;;  %v659_v38 = vcombine.high %v649_v43, %v649_v43 }
 0x16a   :  { %v3440_v15 = vpop.f32.mrb[14].mxu0  ;;  %v785_v60 = vmax.f32 %v753_v51, 0.0  ;;  %v871_v0 = vsel %vm145_vm0, %v821_v4, 0.0  ;;  %v626_v62 = vrot.slane %v612_v10, %v4253_v6 }
 0x16b   :  { %v756_v61 = vadd.f32 %v3440_v15, %v692_v23  ;;  %v378_v14 = vpop.f32.mrb[15].mxu0  ;;  %863 = vadd.xlane.f32.xlu0 %v862_v12  ;;  %v874_v12 = vsel %vm145_vm0, %v822_v1, 0.0  ;;  %v708_v43 = vrot.slane %v659_v38, %v4257_v28 }
 0x16c   :  { %v755_v3 = vadd.f32 %v692_v23, %v378_v14  ;;  %v823_v23 = vmul.f32 %v4266_v24, %v784_v34  ;;  %v824_v14 = vmul.f32 %v4266_v24, %v785_v60  ;;  %v825_v34 = vmul.f32 %v4266_v24, %v786_v19 }
 0x16d   :  { %866 = vadd.xlane.f32.xlu1 %v865_v56  ;;  %v788_v57 = vmax.f32 %v756_v61, 0.0  ;;  %v704_v56 = vrot.slane %v657_v33, %v4257_v28  ;;  %v642_v61 = vrot.slane %v626_v62, %v4253_v6 }
 0x16e   :  { %v3443_v7 = vpop.f32.mrb[16].mxu0  ;;  %v787_v47 = vmax.f32 %v755_v3, 0.0  ;;  %v883_v33 = vsel %vm145_vm0, %v825_v34, 0.0 }
 0x16f   :  { %v758_v63 = vadd.f32 %v3443_v7, %v696_v5  ;;  %v388_v52 = vpop.f32.mrb[17].mxu0  ;;  %869 = vadd.xlane.f32.xlu0 %v868_v55  ;;  %v880_v55 = vsel %vm145_vm0, %v824_v14, 0.0  ;;  %v827_v19 = vmul.f32 %v4266_v24, %v788_v57  ;;  %v712_v14 = vrot.slane %v642_v61, %v4257_v28 }
 0x170   :  { %v757_v9 = vadd.f32 %v696_v5, %v388_v52  ;;  %v877_v5 = vsel %vm145_vm0, %v823_v23, 0.0  ;;  %v826_v60 = vmul.f32 %v4266_v24, %v787_v47 }
 0x171   :  { %872 = vadd.xlane.f32.xlu1 %v871_v0  ;;  %v790_v10 = vmax.f32 %v758_v63, 0.0  ;;  %v628_v0 = vcombine.high %v626_v62, %v626_v62  ;;  %v889_v63 = vsel %vm145_vm0, %v827_v19, 0.0 }
 0x172   :  { %v3446_v51 = vpop.f32.mrb[18].mxu0  ;;  %v789_v4 = vmax.f32 %v757_v9, 0.0 }
 0x173   :  { %v760_v15 = vadd.f32 %v3446_v51, %v700_v29  ;;  %v398_v8 = vpop.f32.mrb[19].mxu0  ;;  %875 = vadd.xlane.f32.xlu0 %v874_v12  ;;  %v886_v51 = vsel %vm145_vm0, %v826_v60, 0.0  ;;  %v656_v62 = vrot.slane %v628_v0, %v4253_v6 }
 0x174   :  { %v759_v42 = vadd.f32 %v700_v29, %v398_v8  ;;  %v828_v47 = vmul.f32 %v4266_v24, %v789_v4 }
 0x175   :  { %878 = vadd.xlane.f32.xlu1 %v877_v5  ;;  %v792_v38 = vmax.f32 %v760_v15, 0.0  ;;  %v829_v5 = vmul.f32 %v4266_v24, %v790_v10 }
 0x176   :  { %v3449_v3 = vpop.f32.mrb[20].mxu0  ;;  %v791_v29 = vmax.f32 %v759_v42, 0.0  ;;  %v892_v34 = vsel %vm145_vm0, %v828_v47, 0.0  ;;  %v660_v47 = vcombine.high %v656_v62, %v656_v62 }
 0x177   :  { %v762_v7 = vadd.f32 %v3449_v3, %v704_v56  ;;  %v408_v52 = vpop.f32.mrb[21].mxu0  ;;  %881 = vadd.xlane.f32.xlu0 %v880_v55  ;;  %v895_v15 = vsel %vm145_vm0, %v829_v5, 0.0  ;;  %v831_v10 = vmul.f32 %v4266_v24, %v792_v38 }
 0x178   :  { %v761_v1 = vadd.f32 %v704_v56, %v408_v52  ;;  %v830_v4 = vmul.f32 %v4266_v24, %v791_v29  ;;  %v658_v52 = vcombine.high %v642_v61, %v642_v61 }
 0x179   :  { %884 = vadd.xlane.f32.xlu1 %v883_v33  ;;  %v794_v60 = vmax.f32 %v762_v7, 0.0 }
 0x17a   :  { %v3452_v9 = vpop.f32.mrb[22].mxu0  ;;  %v793_v42 = vmax.f32 %v761_v1, 0.0  ;;  %v898_v19 = vsel %vm145_vm0, %v830_v4, 0.0  ;;  %v720_v61 = vrot.slane %v658_v52, %v4257_v28 }
 0x17b   :  { %v764_v23 = vadd.f32 %v3452_v9, %v708_v43  ;;  %v418_v12 = vpop.f32.mrb[23].mxu0  ;;  %887 = vadd.xlane.f32.xlu0 %v886_v51  ;;  %v901_v51 = vsel %vm145_vm0, %v831_v10, 0.0 }
 0x17c   :  { %v763_v8 = vadd.f32 %v708_v43, %v418_v12  ;;  %v716_v43 = vrot.slane %v656_v62, %v4257_v28  ;;  %v832_v9 = vmul.f32 %v4266_v24, %v793_v42  ;;  %v833_v12 = vmul.f32 %v4266_v24, %v794_v60 }
 0x17d   :  { %890 = vadd.xlane.f32.xlu1 %v889_v63  ;;  %v796_v7 = vmax.f32 %v764_v23, 0.0  ;;  %v724_v23 = vrot.slane %v660_v47, %v4257_v28 }
 0x17e   :  { %v3455_v57 = vpop.f32.mrb[24].mxu0  ;;  %v795_v33 = vmax.f32 %v763_v8, 0.0  ;;  %v904_v63 = vsel %vm145_vm0, %v832_v9, 0.0 }
 0x17f   :  { %v766_v56 = vadd.f32 %v3455_v57, %v712_v14  ;;  %v428_v3 = vpop.f32.mrb[25].mxu0  ;;  %893 = vadd.xlane.f32.xlu0 %v892_v34  ;;  %v835_v4 = vmul.f32 %v4266_v24, %v796_v7 }
 0x180   :  { %v765_v55 = vadd.f32 %v712_v14, %v428_v3  ;;  %v834_v57 = vmul.f32 %v4266_v24, %v795_v33  ;;  %v907_v3 = vsel %vm145_vm0, %v833_v12, 0.0 }
 0x181   :  { %896 = vadd.xlane.f32.xlu1 %v895_v15  ;;  %v798_v34 = vmax.f32 %v766_v56, 0.0  ;;  %v913_v56 = vsel %vm145_vm0, %v835_v4, 0.0 }
 0x182   :  { %v3458_v6 = vpop.f32.mrb[26].mxu0  ;;  %v797_v38 = vmax.f32 %v765_v55, 0.0  ;;  %v910_v55 = vsel %vm145_vm0, %v834_v57, 0.0 }
 0x183   :  { %v768_v1 = vadd.f32 %v3458_v6, %v716_v43  ;;  %v438_v0 = vpop.f32.mrb[27].mxu0  ;;  %899 = vadd.xlane.f32.xlu0 %v898_v19  ;;  %v837_v33 = vmul.f32 %v4266_v24, %v798_v34 }
 0x184   :  { %v767_v29 = vadd.f32 %v716_v43, %v438_v0  ;;  %v836_v43 = vmul.f32 %v4266_v24, %v797_v38 }
 0x185   :  { %902 = vadd.xlane.f32.xlu1 %v901_v51  ;;  %v800_v6 = vmax.f32 %v768_v1, 0.0 }
 0x186   :  { %v3461_v14 = vpop.f32.mrb[28].mxu0  ;;  %v799_v52 = vmax.f32 %v767_v29, 0.0  ;;  %v916_v0 = vsel %vm145_vm0, %v836_v43, 0.0 }
 0x187   :  { %v770_v8 = vadd.f32 %v3461_v14, %v720_v61  ;;  %v448_v5 = vpop.f32.mrb[29].mxu0  ;;  %905 = vadd.xlane.f32.xlu0 %v904_v63  ;;  %v839_v7 = vmul.f32 %v4266_v24, %v800_v6 }
 0x188   :  { %v769_v42 = vadd.f32 %v720_v61, %v448_v5  ;;  %v838_v9 = vmul.f32 %v4266_v24, %v799_v52  ;;  %v919_v61 = vsel %vm145_vm0, %v837_v33, 0.0 }
 0x189   :  { %908 = vadd.xlane.f32.xlu1 %v907_v3  ;;  %v802_v29 = vmax.f32 %v770_v8, 0.0  ;;  %v925_v14 = vsel %vm145_vm0, %v839_v7, 0.0 }
 0x18a   :  { %v3464_v62 = vpop.f32.mrb[30].mxu0  ;;  %v801_v19 = vmax.f32 %v769_v42, 0.0  ;;  %v922_v1 = vsel %vm145_vm0, %v838_v9, 0.0 }
 0x18b   :  { %v772_v60 = vadd.f32 %v3464_v62, %v724_v23  ;;  %v458_v15 = vpop.f32.mrb[31].mxu0  ;;  %911 = vadd.xlane.f32.xlu0 %v910_v55  ;;  %v841_v38 = vmul.f32 %v4266_v24, %v802_v29 }
 0x18c   :  { %v771_v10 = vadd.f32 %v724_v23, %v458_v15  ;;  %v840_v12 = vmul.f32 %v4266_v24, %v801_v19  ;;  %v5146_v15 = vlaneseq }
 0x18d   :  { %914 = vadd.xlane.f32.xlu1 %v913_v56  ;;  %v804_v47 = vmax.f32 %v772_v60, 0.0  ;;  %v931_v5 = vsel %vm145_vm0, %v841_v38, 0.0 }
 0x18e   :  { %v803_v51 = vmax.f32 %v771_v10, 0.0  ;;  %v928_v63 = vsel %vm145_vm0, %v840_v12, 0.0  ;;  %v1007_v43 = vand.u32 127, %v5146_v15 }
 0x18f   :  { %917 = vadd.xlane.f32.xlu0 %v916_v0  ;;  %v843_v57 = vmul.f32 %v4266_v24, %v804_v47 }
 0x190   :  { %v842_v8 = vmul.f32 %v4266_v24, %v803_v51  ;;  %v1012_v6 = vadd.s32 4294967288, %v1007_v43  ;;  %v4361_v24 = vstv %s5078_s6  ;;  %s3940_s6 = smov [#allocation15]  }
 0x191   :  { %920 = vadd.xlane.f32.xlu1 %v919_v61  ;;  %v937_v34 = vsel %vm145_vm0, %v843_v57, 0.0  ;;  %s3248_s13 = sshll.u32 %s3940_s6, 4  ;;  %s3249_s13 = int_to_ptr.vmem [resolvable:$true] %s3248_s13 }
 0x192   :  { %v934_v42 = vsel %vm145_vm0, %v842_v8, 0.0  ;;  %v4367_v0 = vsub.s32 %v1012_v6, %v4250_v2  ;;  %s3871_s14 = scalar_lea.vmem %s3249_s13, 256  ;;  %p3876_p7 = scmp.lt.s32.totalorder %s3249_s13, %s3249_s13 }
 0x193   :  { %923 = vadd.xlane.f32.xlu0 %v922_v1  ;;  %v4382_v1 = vsub.s32 %v1007_v43, %v4250_v2  ;;  %p3872_p6 = scmp.ne.s32.totalorder %s3249_s13, %s3871_s14  ;;  %p3877_p8 = scmp.lt.s32.totalorder %s3871_s14, %s3871_s14 }
 0x195   :  { %926 = vadd.xlane.f32.xlu1 %v925_v14  ;;  %p3878_p9 = por %p3877_p8, %p3876_p7 }
 0x197   :  { %929 = vadd.xlane.f32.xlu0 %v928_v63  ;;  %p3879_p10 = pnand %p3878_p9, %p3872_p6 }
 0x199   :  { %932 = vadd.xlane.f32.xlu1 %v931_v5 }
 0x19b   :  { %935 = vadd.xlane.f32.xlu0 %v934_v42 }
 0x19d   :  { %938 = vadd.xlane.f32.xlu1 %v937_v34 }
 0x1ec   :  { %v846_v3 = vpop.xlane.xlu0 %845 }
 0x1ed   :  { %v4385_v12 = vadd.f32 %v4361_v24, %v846_v3 }
 0x1ee   :  { %v852_v23 = vpop.xlane.xlu1 %851 }
 0x1ef   :  { %v4376_v7 = vadd.f32 %v4361_v24, %v852_v23 }
 0x1f0   :  { %v849_v4 = vpop.xlane.xlu0 %848 }
 0x1f1   :  { %v4370_v9 = vadd.f32 %v4361_v24, %v849_v4  ;;  %v1022_v23 = vrot.slane %v4376_v7, %v4382_v1 }
 0x1f2   :  { %v855_v62 = vpop.xlane.xlu1 %854 }
 0x1f3   :  { %v4364_v19 = vadd.f32 %v4361_v24, %v855_v62  ;;  %v1016_v57 = vrot.slane %v4370_v9, %v4367_v0 }
 0x1f4   :  { %v858_v52 = vpop.xlane.xlu0 %857 }
 0x1f5   :  { %v4388_v47 = vadd.f32 %v4361_v24, %v858_v52  ;;  %v1026_v63 = vrot.slane %v4364_v19, %v4367_v0  ;;  %v1011_v52 = vrot.slane %v4385_v12, %v4382_v1 }
 0x1f6   :  { %v861_v60 = vpop.xlane.xlu1 %860 }
 0x1f7   :  { %v4373_v29 = vadd.f32 %v4361_v24, %v861_v60  ;;  %v1031_v60 = vrot.slane %v4388_v47, %v4382_v1 }
 0x1f8   :  { %v864_v55 = vpop.xlane.xlu0 %863 }
 0x1f9   :  { %v4396_v8 = vadd.f32 %v4361_v24, %v864_v55  ;;  %v1035_v42 = vrot.slane %v4373_v29, %v4367_v0 }
 0x1fa   :  { %v867_v10 = vpop.xlane.xlu1 %866 }
 0x1fb   :  { %v4379_v51 = vadd.f32 %v4361_v24, %v867_v10  ;;  %v1027_v10 = vsel %vm1017_vm1, %v1026_v63, %v1022_v23  ;;  %v1040_v6 = vrot.slane %v4396_v8, %v4382_v1 }
 0x1fc   :  { %v870_v56 = vpop.xlane.xlu0 %869 }
 0x1fd   :  { %v4406_v34 = vadd.f32 %v4361_v24, %v870_v56  ;;  %v1044_v4 = vrot.slane %v4379_v51, %v4367_v0 }
 0x1fe   :  { %v873_v33 = vpop.xlane.xlu1 %872 }
 0x1ff   :  { %v4391_v14 = vadd.f32 %v4361_v24, %v873_v33  ;;  %v1045_v63 = vsel %vm1017_vm1, %v1044_v4, %v1040_v6 }
 0x200   :  { %v876_v61 = vpop.xlane.xlu0 %875 }
 0x201   :  { %v4413_v62 = vadd.f32 %v4361_v24, %v876_v61  ;;  %v1053_v55 = vrot.slane %v4391_v14, %v4367_v0  ;;  %v1018_v61 = vsel %vm1017_vm1, %v1016_v57, %v1011_v52 }
 0x202   :  { %v879_v38 = vpop.xlane.xlu1 %878  ;;  %v1155_v57 = vsel %vm1154_vm2, %v1027_v10, %v1018_v61 }
 0x203   :  { %v4399_v5 = vadd.f32 %v4361_v24, %v879_v38  ;;  %v1036_v38 = vsel %vm1017_vm1, %v1035_v42, %v1031_v60  ;;  %v1058_v23 = vrot.slane %v4413_v62, %v4382_v1 }
 0x204   :  { %v882_v3 = vpop.xlane.xlu0 %881  ;;  %v1157_v4 = vsel %vm1156_vm3, %v1036_v38, %v1155_v57 }
 0x205   :  { %v4422_v15 = vadd.f32 %v4361_v24, %v882_v3  ;;  %v1062_v56 = vrot.slane %v4399_v5, %v4367_v0  ;;  %v1049_v3 = vrot.slane %v4406_v34, %v4382_v1  ;;  %v1159_v10 = vsel %vm1158_vm4, %v1045_v63, %v1157_v4 }
 0x206   :  { %v885_v43 = vpop.xlane.xlu1 %884 }
 0x207   :  { %v4430_v33 = vadd.f32 %v4361_v24, %v885_v43  ;;  %v1054_v42 = vsel %vm1017_vm1, %v1053_v55, %v1049_v3  ;;  %v1067_v52 = vrot.slane %v4422_v15, %v4382_v1  ;;  %v1063_v6 = vsel %vm1017_vm1, %v1062_v56, %v1058_v23 }
 0x208   :  { %v888_v53 = vpop.xlane.xlu0 %887  ;;  %v1161_v38 = vsel %vm1160_vm5, %v1054_v42, %v1159_v10 }
 0x209   :  { %v1071_v54 = vrot.slane %v4430_v33, %v4367_v0  ;;  %v4442_v43 = vadd.f32 %v4361_v24, %v888_v53  ;;  %v1163_v3 = vsel %vm1162_vm6, %v1063_v6, %v1161_v38 }
 0x20a   :  { %v891_v60 = vpop.xlane.xlu1 %890 }
 0x20b   :  { %v4451_v49 = vadd.f32 %v4361_v24, %v891_v60  ;;  %v1072_v53 = vsel %vm1017_vm1, %v1071_v54, %v1067_v52  ;;  %v1076_v55 = vrot.slane %v4442_v43, %v4382_v1 }
 0x20c   :  { %v894_v50 = vpop.xlane.xlu0 %893  ;;  %v1165_v54 = vsel %vm1164_vm7, %v1072_v53, %v1163_v3 }
 0x20d   :  { %v1080_v61 = vrot.slane %v4451_v49, %v4367_v0 }
 0x20e   :  { %v897_v56 = vpop.xlane.xlu1 %896 }
 0x20f   :  { %v1081_v23 = vsel %vm1017_vm1, %v1080_v61, %v1076_v55  ;;  %v4469_v55 = vadd.f32 %v4361_v24, %v897_v56 }
 0x210   :  { %v900_v57 = vpop.xlane.xlu0 %899  ;;  %v1167_v63 = vsel %vm1166_vm8, %v1081_v23, %v1165_v54  ;;  %v4481_v23 = vadd.f32 %v4361_v24, %v894_v50 }
 0x211   :  { %v1178_v52 = vsel %vm1177_vm9, %v1167_v63, -inf  ;;  %v4475_v38 = vadd.f32 %v4361_v24, %v900_v57  ;;  %v1089_v50 = vrot.slane %v4469_v55, %v4367_v0 }
 0x212   :  { %v903_v60 = vpop.xlane.xlu1 %902  ;;  %1179 = vmax.xlane.f32.xlu0 %v1178_v52 }
 0x213   :  { %v4466_v6 = vadd.f32 %v4361_v24, %v903_v60 }
 0x214   :  { %v906_v4 = vpop.xlane.xlu0 %905 }
 0x215   :  { %v4484_v54 = vadd.f32 %v4361_v24, %v906_v4 }
 0x216   :  { %v909_v46 = vpop.xlane.xlu1 %908 }
 0x217   :  { %v4472_v53 = vadd.f32 %v4361_v24, %v909_v46  ;;  %v1098_v46 = vrot.slane %v4466_v6, %v4367_v0  ;;  %v1103_v40 = vrot.slane %v4484_v54, %v4382_v1 }
 0x218   :  { %v912_v48 = vpop.xlane.xlu0 %911 }
 0x219   :  { %v4492_v52 = vadd.f32 %v4361_v24, %v912_v48  ;;  %v1107_v60 = vrot.slane %v4472_v53, %v4367_v0 }
 0x21a   :  { %v915_v42 = vpop.xlane.xlu1 %914 }
 0x21b   :  { %v4478_v3 = vadd.f32 %v4361_v24, %v915_v42  ;;  %v1094_v42 = vrot.slane %v4475_v38, %v4382_v1  ;;  %v1112_v35 = vrot.slane %v4492_v52, %v4382_v1  ;;  %v1108_v32 = vsel %vm1017_vm1, %v1107_v60, %v1103_v40 }
 0x21c   :  { %v918_v10 = vpop.xlane.xlu0 %917 }
 0x21d   :  { %v4502_v4 = vadd.f32 %v4361_v24, %v918_v10  ;;  %v1116_v48 = vrot.slane %v4478_v3, %v4367_v0  ;;  %v1099_v39 = vsel %vm1017_vm1, %v1098_v46, %v1094_v42 }
 0x21e   :  { %v921_v44 = vpop.xlane.xlu1 %920 }
 0x21f   :  { %v4487_v63 = vadd.f32 %v4361_v24, %v921_v44  ;;  %v1117_v30 = vsel %vm1017_vm1, %v1116_v48, %v1112_v35 }
 0x220   :  { %v924_v61 = vpop.xlane.xlu0 %923 }
 0x221   :  { %v4509_v45 = vadd.f32 %v4361_v24, %v924_v61  ;;  %v1125_v10 = vrot.slane %v4487_v63, %v4367_v0 }
 0x222   :  { %v927_v56 = vpop.xlane.xlu1 %926 }
 0x223   :  { %v4495_v57 = vadd.f32 %v4361_v24, %v927_v56  ;;  %v1085_v56 = vrot.slane %v4481_v23, %v4382_v1  ;;  %v1130_v46 = vrot.slane %v4509_v45, %v4382_v1 }
 0x224   :  { %v930_v44 = vpop.xlane.xlu0 %929 }
 0x225   :  { %v4518_v41 = vadd.f32 %v4361_v24, %v930_v44  ;;  %v1134_v61 = vrot.slane %v4495_v57, %v4367_v0  ;;  %v1090_v31 = vsel %vm1017_vm1, %v1089_v50, %v1085_v56  ;;  %v1121_v44 = vrot.slane %v4502_v4, %v4382_v1 }
 0x226   :  { %v933_v37 = vpop.xlane.xlu1 %932 }
 0x227   :  { %v4526_v36 = vadd.f32 %v4361_v24, %v933_v37  ;;  %v1168_v37 = vsel %vm1154_vm2, %v1099_v39, %v1090_v31  ;;  %v1126_v50 = vsel %vm1017_vm1, %v1125_v10, %v1121_v44  ;;  %v1139_v40 = vrot.slane %v4518_v41, %v4382_v1 }
 0x228   :  { %v936_v27 = vpop.xlane.xlu0 %935  ;;  %v1169_v56 = vsel %vm1156_vm3, %v1108_v32, %v1168_v37  ;;  %v1135_v35 = vsel %vm1017_vm1, %v1134_v61, %v1130_v46  ;;  %v3936_v46 = vmov 0  }
 0x229   :  { %v1143_v42 = vrot.slane %v4526_v36, %v4367_v0  ;;  %v4538_v25 = vadd.f32 %v4361_v24, %v936_v27  ;;  %v1170_v26 = vsel %vm1158_vm4, %v1117_v30, %v1169_v56  ;;  %3670 = vset.pattern.permute.xlu1 %v3936_v46  ;;  %3669 = vset.pattern.permute.xlu0 %v3936_v46  ;;  %v4589_v46 = vsub.s32 7, %v4250_v2 }
 0x22a   :  { %v939_v60 = vpop.xlane.xlu1 %938  ;;  %v1171_v10 = vsel %vm1160_vm5, %v1126_v50, %v1170_v26  ;;  %v4566_v50 = vsub.s32 4, %v4250_v2 }
 0x22b   :  { %v4547_v48 = vadd.f32 %v4361_v24, %v939_v60  ;;  %v1144_v27 = vsel %vm1017_vm1, %v1143_v42, %v1139_v40  ;;  %v1148_v31 = vrot.slane %v4538_v25, %v4382_v1  ;;  %v1172_v44 = vsel %vm1162_vm6, %v1135_v35, %v1171_v10 }
 0x22c   :  { %v1173_v61 = vsel %vm1164_vm7, %v1144_v27, %v1172_v44  ;;  %v4562_v42 = vsub.s32 1, %v4250_v2  ;;  %v4572_v35 = vsub.s32 2, %v4250_v2  ;;  %v4575_v27 = vsub.s32 5, %v4250_v2 }
 0x22d   :  { %v1152_v39 = vrot.slane %v4547_v48, %v4367_v0 }
 0x22f   :  { %v1153_v32 = vsel %vm1017_vm1, %v1152_v39, %v1148_v31 }
 0x230   :  { %v1174_v24 = vsel %vm1166_vm8, %v1153_v32, %v1173_v61  ;;  %v4580_v32 = vsub.s32 6, %v4250_v2 }
 0x231   :  { %v1181_v30 = vsel %vm1177_vm9, %v1174_v24, -inf }
 0x232   :  { %1182 = vmax.xlane.f32.xlu1 %v1181_v30 }
 0x29f   :  { %v1180_v37 = vpop.xlane.xlu0 %1179 }
 0x2a0   :  { %v1189_v26 = vrot.slane %v1180_v37, %v4257_v28  ;;  %v1193_v40 = vrot.slane %v1180_v37, %v4562_v42  ;;  %v1205_v31 = vrot.slane %v1180_v37, %v4566_v50  ;;  %v1197_v61 = vrot.slane %v1180_v37, %v4572_v35 }
 0x2a2   :  { %v1266_v60 = vsub.f32 %v4385_v12, %v1189_v26  ;;  %v1267_v56 = vsub.f32 %v4370_v9, %v1189_v26  ;;  %v1268_v39 = vsub.f32 %v4376_v7, %v1193_v40  ;;  %v1269_v12 = vsub.f32 %v4364_v19, %v1193_v40 }
 0x2a3   :  { %v4585_v9 = vrot.slane %v1180_v37, %v4575_v27  ;;  %v1275_v24 = vsub.f32 %v4391_v14, %v1205_v31  ;;  %v1270_v7 = vsub.f32 %v4388_v47, %v1197_v61 }
 0x2a4   :  { %v1298_v10 = vmul.f32 1.442695, %v1266_v60  ;;  %v1300_v44 = vmul.f32 1.442695, %v1267_v56  ;;  %v1302_v30 = vmul.f32 1.442695, %v1268_v39  ;;  %v4593_v60 = vrot.slane %v1180_v37, %v4580_v32 }
 0x2a5   :  { %v1304_v26 = vmul.f32 1.442695, %v1269_v12  ;;  %v1277_v19 = vsub.f32 %v4399_v5, %v4585_v9  ;;  %v1316_v40 = vmul.f32 1.442695, %v1275_v24  ;;  %v4598_v56 = vsub.s32 3, %v4250_v2 }
 0x2a6   :  { %3671 = vpow2.f32 %v1298_v10  ;;  %v1306_v14 = vmul.f32 1.442695, %v1270_v7  ;;  %v4601_v39 = vrot.slane %v1180_v37, %v4589_v46  ;;  %v1279_v47 = vsub.f32 %v4430_v33, %v4593_v60 }
 0x2a7   :  { %3673 = vpow2.f32 %v1300_v44  ;;  %v1320_v10 = vmul.f32 1.442695, %v1277_v19  ;;  %v1201_v12 = vrot.slane %v1180_v37, %v4598_v56  ;;  %v1271_v5 = vsub.f32 %v4373_v29, %v1197_v61 }
 0x2a8   :  { %3675 = vpow2.f32 %v1302_v30  ;;  %v1281_v2 = vsub.f32 %v4451_v49, %v4601_v39  ;;  %v1324_v33 = vmul.f32 1.442695, %v1279_v47 }
 0x2a9   :  { %3677 = vpow2.f32 %v1304_v26  ;;  %v1272_v30 = vsub.f32 %v4396_v8, %v1201_v12  ;;  %v1308_v7 = vmul.f32 1.442695, %v1271_v5  ;;  %v1273_v61 = vsub.f32 %v4379_v51, %v1201_v12 }
 0x2aa   :  { %3679 = vpow2.f32 %v1316_v40  ;;  %v1328_v29 = vmul.f32 1.442695, %v1281_v2  ;;  %v1274_v8 = vsub.f32 %v4406_v34, %v1205_v31  ;;  %v1276_v5 = vsub.f32 %v4413_v62, %v4585_v9 }
 0x2ab   :  { %3681 = vpow2.f32 %v1306_v14  ;;  %v1310_v19 = vmul.f32 1.442695, %v1272_v30  ;;  %v1312_v14 = vmul.f32 1.442695, %v1273_v61 }
 0x2ac   :  { %3683 = vpow2.f32 %v1320_v10  ;;  %v1314_v2 = vmul.f32 1.442695, %v1274_v8  ;;  %v1318_v62 = vmul.f32 1.442695, %v1276_v5 }
 0x2ad   :  { %3685 = vpow2.f32 %v1324_v33 }
 0x2ae   :  { %3687 = vpow2.f32 %v1308_v7 }
 0x2af   :  { %3689 = vpow2.f32 %v1328_v29  ;;  %v1278_v29 = vsub.f32 %v4422_v15, %v4593_v60  ;;  %v1280_v15 = vsub.f32 %v4442_v43, %v4601_v39 }
 0x2b0   :  { %v4605_v44 = vpop.eup %3671  ;;  %3691 = vpow2.f32 %v1310_v19 }
 0x2b1   :  { %v4609_v24 = vpop.eup %3673  ;;  %1395 = vperm.xlu0 %3669, %v4605_v44   ;;  %3693 = vpow2.f32 %v1312_v14  ;;  %v1322_v60 = vmul.f32 1.442695, %v1278_v29 }
 0x2b2   :  { %1398 = vperm.xlu1 %3670, %v4609_v24   ;;  %v4616_v26 = vpop.eup %3675  ;;  %3695 = vpow2.f32 %v1314_v2 }
 0x2b3   :  { %v4619_v37 = vpop.eup %3677 }
 0x2b4   :  { %v4622_v40 = vpop.eup %3679 }
 0x2b5   :  { %1422 = vperm.xlu0 %3669, %v4622_v40   ;;  %v4626_v49 = vpop.eup %3681 }
 0x2b6   :  { %1401 = vperm.xlu1 %3670, %v4616_v26   ;;  %v4629_v47 = vpop.eup %3683 }
 0x2b7   :  { %v4638_v31 = vpop.eup %3685 }
 0x2b8   :  { %v4640_v33 = vpop.eup %3687 }
 0x2b9   :  { %1428 = vperm.xlu0 %3669, %v4629_v47   ;;  %v4648_v61 = vpop.eup %3689 }
 0x2ba   :  { %1404 = vperm.xlu1 %3670, %v4619_v37  }
 0x2bd   :  { %1434 = vperm.xlu0 %3669, %v4638_v31  }
 0x2be   :  { %1407 = vperm.xlu1 %3670, %v4626_v49  }
 0x2bf   :  { %v1183_v10 = vpop.xlane.xlu1 %1182 }
 0x2c0   :  { %v1221_v51 = vrot.slane %v1183_v10, %v4257_v28  ;;  %v1225_v12 = vrot.slane %v1183_v10, %v4562_v42  ;;  %v1229_v30 = vrot.slane %v1183_v10, %v4572_v35  ;;  %v1233_v19 = vrot.slane %v1183_v10, %v4598_v56 }
 0x2c1   :  { %1440 = vperm.xlu0 %3669, %v4648_v61   ;;  %v1237_v5 = vrot.slane %v1183_v10, %v4566_v50  ;;  %v1241_v43 = vrot.slane %v1183_v10, %v4575_v27 }
 0x2c2   :  { %v1283_v34 = vsub.f32 %v4469_v55, %v1221_v51  ;;  %v1285_v7 = vsub.f32 %v4466_v6, %v1225_v12  ;;  %1410 = vperm.xlu1 %3670, %v4640_v33   ;;  %v4650_v55 = vpop.eup %3691  ;;  %v1287_v8 = vsub.f32 %v4472_v53, %v1229_v30  ;;  %v1289_v2 = vsub.f32 %v4478_v3, %v1233_v19 }
 0x2c3   :  { %v4658_v14 = vpop.eup %3693  ;;  %v1326_v53 = vmul.f32 1.442695, %v1280_v15  ;;  %v1291_v39 = vsub.f32 %v4487_v63, %v1237_v5  ;;  %v1284_v3 = vsub.f32 %v4475_v38, %v1225_v12  ;;  %v1286_v15 = vsub.f32 %v4484_v54, %v1229_v30 }
 0x2c4   :  { %v1332_v9 = vmul.f32 1.442695, %v1283_v34  ;;  %v1336_v6 = vmul.f32 1.442695, %v1285_v7  ;;  %v1340_v34 = vmul.f32 1.442695, %v1287_v8  ;;  %v1282_v7 = vsub.f32 %v4481_v23, %v1221_v51 }
 0x2c5   :  { %v1344_v29 = vmul.f32 1.442695, %v1289_v2  ;;  %v1245_v23 = vrot.slane %v1183_v10, %v4580_v32  ;;  %v1293_v51 = vsub.f32 %v4495_v57, %v1241_v43  ;;  %v1348_v63 = vmul.f32 1.442695, %v1291_v39 }
 0x2c6   :  { %3697 = vpow2.f32 %v1332_v9  ;;  %1413 = vperm.xlu1 %3670, %v4650_v55   ;;  %v4664_v9 = vpop.eup %3695  ;;  %v1249_v2 = vrot.slane %v1183_v10, %v4589_v46  ;;  %v1338_v54 = vmul.f32 1.442695, %v1286_v15 }
 0x2c7   :  { %3699 = vpow2.f32 %v1318_v62  ;;  %v1330_v62 = vmul.f32 1.442695, %v1282_v7  ;;  %v1352_v57 = vmul.f32 1.442695, %v1293_v51 }
 0x2c8   :  { %3701 = vpow2.f32 %v1336_v6  ;;  %v1297_v39 = vsub.f32 %v4547_v48, %v1249_v2  ;;  %v1292_v48 = vsub.f32 %v4509_v45, %v1241_v43  ;;  %v1296_v45 = vsub.f32 %v4538_v25, %v1249_v2 }
 0x2c9   :  { %3703 = vpow2.f32 %v1322_v60  ;;  %v1334_v60 = vmul.f32 1.442695, %v1284_v3 }
 0x2ca   :  { %1416 = vperm.xlu1 %3670, %v4658_v14   ;;  %3705 = vpow2.f32 %v1340_v34  ;;  %v1295_v34 = vsub.f32 %v4526_v36, %v1245_v23  ;;  %v1290_v36 = vsub.f32 %v4502_v4, %v1237_v5  ;;  %v1294_v4 = vsub.f32 %v4518_v41, %v1245_v23 }
 0x2cb   :  { %3707 = vpow2.f32 %v1326_v53  ;;  %v1288_v53 = vsub.f32 %v4492_v52, %v1233_v19  ;;  %v1360_v19 = vmul.f32 1.442695, %v1297_v39  ;;  %v1350_v5 = vmul.f32 1.442695, %v1292_v48 }
 0x2cc   :  { %3709 = vpow2.f32 %v1344_v29  ;;  %v1356_v10 = vmul.f32 1.442695, %v1295_v34  ;;  %v1354_v43 = vmul.f32 1.442695, %v1294_v4  ;;  %v1358_v41 = vmul.f32 1.442695, %v1296_v45 }
 0x2cd   :  { %3711 = vpow2.f32 %v1330_v62  ;;  %v1342_v29 = vmul.f32 1.442695, %v1288_v53  ;;  %v1346_v62 = vmul.f32 1.442695, %v1290_v36 }
 0x2ce   :  { %1419 = vperm.xlu1 %3670, %v4664_v9   ;;  %3713 = vpow2.f32 %v1348_v63 }
 0x2cf   :  { %3715 = vpow2.f32 %v1334_v60 }
 0x2d0   :  { %v4670_v8 = vpop.eup %3697  ;;  %3717 = vpow2.f32 %v1352_v57 }
 0x2d1   :  { %v4672_v6 = vpop.eup %3699  ;;  %1446 = vperm.xlu0 %3669, %v4670_v8   ;;  %3719 = vpow2.f32 %v1338_v54 }
 0x2d2   :  { %1425 = vperm.xlu1 %3670, %v4672_v6   ;;  %v4679_v38 = vpop.eup %3701  ;;  %3721 = vpow2.f32 %v1356_v10 }
 0x2d3   :  { %v4681_v12 = vpop.eup %3703  ;;  %3723 = vpow2.f32 %v1342_v29 }
 0x2d4   :  { %v4688_v30 = vpop.eup %3705  ;;  %3725 = vpow2.f32 %v1360_v19 }
 0x2d5   :  { %1452 = vperm.xlu0 %3669, %v4679_v38   ;;  %v4690_v7 = vpop.eup %3707  ;;  %3727 = vpow2.f32 %v1346_v62 }
 0x2d6   :  { %1431 = vperm.xlu1 %3670, %v4681_v12   ;;  %v4696_v3 = vpop.eup %3709  ;;  %3729 = vpow2.f32 %v1350_v5 }
 0x2d7   :  { %v4698_v52 = vpop.eup %3711  ;;  %3731 = vpow2.f32 %v1354_v43 }
 0x2d8   :  { %v4703_v51 = vpop.eup %3713  ;;  %3733 = vpow2.f32 %v1358_v41 }
 0x2d9   :  { %1458 = vperm.xlu0 %3669, %v4688_v30   ;;  %5147 = vst [vmem:[#allocation51_spill] sm:$0xff] %v4703_v51  ;;  %v4705_v63 = vpop.eup %3715 }
 0x2da   :  { %1437 = vperm.xlu1 %3670, %v4690_v7   ;;  %v4710_v15 = vpop.eup %3717 }
 0x2db   :  { %5148 = vst [vmem:[#allocation52_spill] sm:$0xff] %v4710_v15  ;;  %v4712_v60 = vpop.eup %3719 }
 0x2dc   :  { %v4717_v34 = vpop.eup %3721 }
 0x2dd   :  { %1464 = vperm.xlu0 %3669, %v4696_v3   ;;  %5149 = vst [vmem:[#allocation53_spill] sm:$0xff] %v4717_v34  ;;  %v4719_v57 = vpop.eup %3723 }
 0x2de   :  { %1443 = vperm.xlu1 %3670, %v4698_v52   ;;  %v4723_v23 = vpop.eup %3725 }
 0x2df   :  { %5150 = vst [vmem:[#allocation54_spill] sm:$0xff] %v4723_v23  ;;  %v4725_v53 = vpop.eup %3727 }
 0x2e0   :  { %5151 = vst [vmem:[#allocation55_spill] sm:$0xff] %v4725_v53  ;;  %v4729_v25 = vpop.eup %3729 }
 0x2e1   :  { %1470 = vperm.xlu0 %3669, %v4703_v51   ;;  %5152 = vst [vmem:[#allocation56_spill] sm:$0xff] %v4729_v25  ;;  %v4732_v2 = vpop.eup %3731 }
 0x2e2   :  { %1449 = vperm.xlu1 %3670, %v4705_v63   ;;  %5153 = vst [vmem:[#allocation57_spill] sm:$0xff] %v4732_v2  ;;  %v4735_v54 = vpop.eup %3733 }
 0x2e3   :  { %5154 = vst [vmem:[#allocation58_spill] sm:$0xff] %v4735_v54 }
 0x2e5   :  { %1476 = vperm.xlu0 %3669, %v4710_v15  }
 0x2e6   :  { %1455 = vperm.xlu1 %3670, %v4712_v60  }
 0x2e9   :  { %1482 = vperm.xlu0 %3669, %v4717_v34  }
 0x2ea   :  { %1461 = vperm.xlu1 %3670, %v4719_v57  }
 0x2ed   :  { %1488 = vperm.xlu0 %3669, %v4723_v23  }
 0x2ee   :  { %1467 = vperm.xlu1 %3670, %v4725_v53  }
 0x2f2   :  { %1473 = vperm.xlu1 %3670, %v4729_v25  }
 0x2f6   :  { %1479 = vperm.xlu1 %3670, %v4732_v2  }
 0x2fa   :  { %1485 = vperm.xlu1 %3670, %v4735_v54  }
 0x330   :  { %v1396_v10 = vpop.permute.xlu0 %1395 }
 0x331   :  { %v1399_v39 = vpop.permute.xlu1 %1398  ;;  %v1493_v54 = vrot.slane %v1396_v10, %v4382_v1 }
 0x332   :  { %v1497_v17 = vrot.slane %v1399_v39, %v4367_v0 }
 0x334   :  { %v1423_v19 = vpop.permute.xlu0 %1422 }
 0x335   :  { %v1402_v36 = vpop.permute.xlu1 %1401  ;;  %v1533_v51 = vrot.slane %v1423_v19, %v4367_v0 }
 0x336   :  { %v1502_v23 = vrot.slane %v1402_v36, %v4382_v1  ;;  %v1498_v36 = vsel %vm1017_vm1, %v1497_v17, %v1493_v54 }
 0x338   :  { %v1429_v62 = vpop.permute.xlu0 %1428 }
 0x339   :  { %v1405_v29 = vpop.permute.xlu1 %1404 }
 0x33a   :  { %v1506_v22 = vrot.slane %v1405_v29, %v4367_v0 }
 0x33c   :  { %v1435_v45 = vpop.permute.xlu0 %1434  ;;  %v1507_v15 = vsel %vm1017_vm1, %v1506_v22, %v1502_v23 }
 0x33d   :  { %v1408_v48 = vpop.permute.xlu1 %1407  ;;  %v1634_v22 = vsel %vm1154_vm2, %v1507_v15, %v1498_v36  ;;  %v1551_v23 = vrot.slane %v1435_v45, %v4367_v0 }
 0x33e   :  { %v1511_v34 = vrot.slane %v1408_v48, %v4382_v1 }
 0x340   :  { %v1441_v41 = vpop.permute.xlu0 %1440 }
 0x341   :  { %v1411_v4 = vpop.permute.xlu1 %1410 }
 0x342   :  { %v1515_v20 = vrot.slane %v1411_v4, %v4367_v0 }
 0x344   :  { %v1516_v39 = vsel %vm1017_vm1, %v1515_v20, %v1511_v34 }
 0x345   :  { %v1414_v5 = vpop.permute.xlu1 %1413 }
 0x346   :  { %v1520_v29 = vrot.slane %v1414_v5, %v4382_v1  ;;  %v1635_v5 = vsel %vm1156_vm3, %v1516_v39, %v1634_v22 }
 0x349   :  { %v1417_v43 = vpop.permute.xlu1 %1416 }
 0x34a   :  { %v1524_v2 = vrot.slane %v1417_v43, %v4367_v0  ;;  %v1542_v43 = vrot.slane %v1429_v62, %v4367_v0 }
 0x34c   :  { %v1525_v48 = vsel %vm1017_vm1, %v1524_v2, %v1520_v29  ;;  %v1560_v2 = vrot.slane %v1441_v41, %v4367_v0 }
 0x34d   :  { %v1420_v21 = vpop.permute.xlu1 %1419  ;;  %v1636_v20 = vsel %vm1158_vm4, %v1525_v48, %v1635_v5 }
 0x34e   :  { %v1529_v25 = vrot.slane %v1420_v21, %v4382_v1 }
 0x350   :  { %v4739_v18 = vpop.permute.xlu0 %1446 }
 0x351   :  { %v1426_v16 = vpop.permute.xlu1 %1425 }
 0x352   :  { %v1538_v53 = vrot.slane %v1426_v16, %v4382_v1  ;;  %v1534_v16 = vsel %vm1017_vm1, %v1533_v51, %v1529_v25 }
 0x353   :  { %v1637_v62 = vsel %vm1160_vm5, %v1534_v16, %v1636_v20 }
 0x354   :  { %v1453_v4 = vpop.permute.xlu0 %1452  ;;  %v1543_v19 = vsel %vm1017_vm1, %v1542_v43, %v1538_v53 }
 0x355   :  { %v1432_v10 = vpop.permute.xlu1 %1431  ;;  %v1638_v45 = vsel %vm1162_vm6, %v1543_v19, %v1637_v62  ;;  %v1578_v20 = vrot.slane %v1453_v4, %v4367_v0 }
 0x356   :  { %v1547_v21 = vrot.slane %v1432_v10, %v4382_v1 }
 0x358   :  { %v1552_v17 = vsel %vm1017_vm1, %v1551_v23, %v1547_v21  ;;  %v1459_v54 = vpop.permute.xlu0 %1458 }
 0x359   :  { %v1438_v34 = vpop.permute.xlu1 %1437  ;;  %v1639_v25 = vsel %vm1164_vm7, %v1552_v17, %v1638_v45 }
 0x35a   :  { %v1556_v15 = vrot.slane %v1438_v34, %v4382_v1 }
 0x35c   :  { %v1561_v51 = vsel %vm1017_vm1, %v1560_v2, %v1556_v15  ;;  %v1465_v10 = vpop.permute.xlu0 %1464  ;;  %v1587_v2 = vrot.slane %v1459_v54, %v4367_v0  ;;  %v1569_v15 = vrot.slane %v4739_v18, %v4367_v0 }
 0x35d   :  { %v1444_v29 = vpop.permute.xlu1 %1443  ;;  %v1640_v53 = vsel %vm1166_vm8, %v1561_v51, %v1639_v25  ;;  %v1596_v45 = vrot.slane %v1465_v10, %v4367_v0 }
 0x35e   :  { %v1650_v39 = vsel %vm1177_vm9, %v1640_v53, 0.0  ;;  %v1565_v17 = vrot.slane %v1444_v29, %v4382_v1 }
 0x35f   :  { %1651 = vadd.xlane.f32.xlu1 %v1650_v39 }
 0x360   :  { %v1471_v43 = vpop.permute.xlu0 %1470  ;;  %v1570_v39 = vsel %vm1017_vm1, %v1569_v15, %v1565_v17 }
 0x361   :  { %v1450_v36 = vpop.permute.xlu1 %1449  ;;  %v1605_v53 = vrot.slane %v1471_v43, %v4367_v0 }
 0x362   :  { %v1574_v23 = vrot.slane %v1450_v36, %v4382_v1 }
 0x364   :  { %v1477_v21 = vpop.permute.xlu0 %1476  ;;  %v1579_v51 = vsel %vm1017_vm1, %v1578_v20, %v1574_v23 }
 0x365   :  { %v1456_v41 = vpop.permute.xlu1 %1455  ;;  %v1614_v54 = vrot.slane %v1477_v21, %v4367_v0  ;;  %v1641_v18 = vsel %vm1154_vm2, %v1579_v51, %v1570_v39  ;;  %v3937_v51 = vmov 0.0|0.0  }
 0x366   :  { %v1583_v16 = vrot.slane %v1456_v41, %v4382_v1  ;;  %3649 = vmatprep.subr.bf16.mxu0 %v3937_v51  ;;  %3604 = vmatprep.subr.bf16.mxu1 %v3937_v51 }
 0x368   :  { %v1483_v5 = vpop.permute.xlu0 %1482  ;;  %v1588_v4 = vsel %vm1017_vm1, %v1587_v2, %v1583_v16 }
 0x369   :  { %v1462_v48 = vpop.permute.xlu1 %1461  ;;  %v1623_v10 = vrot.slane %v1483_v5, %v4367_v0  ;;  %v1642_v43 = vsel %vm1156_vm3, %v1588_v4, %v1641_v18 }
 0x36a   :  { %v1592_v34 = vrot.slane %v1462_v48, %v4382_v1 }
 0x36c   :  { %v1597_v36 = vsel %vm1017_vm1, %v1596_v45, %v1592_v34 }
 0x36d   :  { %v1468_v22 = vpop.permute.xlu1 %1467  ;;  %v1643_v16 = vsel %vm1158_vm4, %v1597_v36, %v1642_v43 }
 0x36e   :  { %v1601_v62 = vrot.slane %v1468_v22, %v4382_v1  ;;  %v1489_v22 = vpop.permute.xlu0 %1488 }
 0x36f   :  { %v1632_v17 = vrot.slane %v1489_v22, %v4367_v0 }
 0x370   :  { %v1606_v48 = vsel %vm1017_vm1, %v1605_v53, %v1601_v62  ;;  %v5156_v53 = vpack.c.bf16 %v4089_v13, %v4087_v11 }
 0x371   :  { %v1474_v19 = vpop.permute.xlu1 %1473  ;;  %v1644_v20 = vsel %vm1160_vm5, %v1606_v48, %v1643_v16 }
 0x372   :  { %v1610_v25 = vrot.slane %v1474_v19, %v4382_v1  ;;  %3606 = vmatpush3.bf16.msra.mxu1 %v5156_v53  ;;  %v5163_v53 = vld [vmem:[#allocation54_spill] sm:$0xff] }
 0x373   :  { %3607 = vmatprep.subr.bf16.mxu1 %v3937_v51 }
 0x374   :  { %v1615_v23 = vsel %vm1017_vm1, %v1614_v54, %v1610_v25  ;;  %v5155_v25 = vpack.c.bf16 %v4185_v59, %v4183_v58  ;;  %v3939_v59 = vmov 0.0  }
 0x375   :  { %v1480_v29 = vpop.permute.xlu1 %1479  ;;  %v1645_v5 = vsel %vm1162_vm6, %v1615_v23, %v1644_v20  ;;  %3480 = vmatprep.mubr.msk.f32.mxu1 %vm3938_vm10, %v3939_v59  ;;  %3585 = vmatprep.mubr.msk.f32.mxu0 %vm3938_vm10, %v3939_v59 }
 0x376   :  { %v1619_v41 = vrot.slane %v1480_v29, %v4382_v1  ;;  %3651 = vmatpush3.bf16.msra.mxu0 %v5155_v25 }
 0x378   :  { %v1624_v19 = vsel %vm1017_vm1, %v1623_v10, %v1619_v41 }
 0x379   :  { %v1486_v21 = vpop.permute.xlu1 %1485  ;;  %v1646_v62 = vsel %vm1164_vm7, %v1624_v19, %v1645_v5 }
 0x37a   :  { %v1628_v34 = vrot.slane %v1486_v21, %v4382_v1 }
 0x37c   :  { %v1633_v2 = vsel %vm1017_vm1, %v1632_v17, %v1628_v34  ;;  %v5158_v34 = vld [vmem:[#allocation55_spill] sm:$0xff] }
 0x37d   :  { %v1647_v15 = vsel %vm1166_vm8, %v1633_v2, %v1646_v62  ;;  %v5160_v2 = vld [vmem:[#allocation56_spill] sm:$0xff] }
 0x37e   :  { %v1653_v45 = vsel %vm1177_vm9, %v1647_v15, 0.0  ;;  %v5162_v15 = vld [vmem:[#allocation57_spill] sm:$0xff] }
 0x37f   :  { %1654 = vadd.xlane.f32.xlu0 %v1653_v45 }
 0x3ec   :  { %v1652_v4 = vpop.xlane.xlu1 %1651 }
 0x3ed   :  { %3735 = vrcp.f32 %v1652_v4  ;;  %v5164_v4 = vld [vmem:[#allocation58_spill] sm:$0xff] }
 0x3f7   :  { %v3736_v29 = vpop.eup %3735 }
 0x3f8   :  { %v1663_v39 = vrot.slane %v3736_v29, %v4257_v28  ;;  %v1667_v41 = vrot.slane %v3736_v29, %v4562_v42  ;;  %v1671_v58 = vrot.slane %v3736_v29, %v4572_v35  ;;  %v1675_v18 = vrot.slane %v3736_v29, %v4598_v56 }
 0x3f9   :  { %v1679_v10 = vrot.slane %v3736_v29, %v4566_v50 }
 0x3fa   :  { %v1741_v54 = vmul.f32 %v4609_v24, %v1663_v39  ;;  %v1740_v36 = vmul.f32 %v4605_v44, %v1663_v39  ;;  %v1742_v11 = vmul.f32 %v4616_v26, %v1667_v41  ;;  %v1743_v13 = vmul.f32 %v4619_v37, %v1667_v41 }
 0x3fb   :  { %v1744_v44 = vmul.f32 %v4626_v49, %v1671_v58  ;;  %v1745_v24 = vmul.f32 %v4640_v33, %v1671_v58  ;;  %v1746_v26 = vmul.f32 %v4650_v55, %v1675_v18  ;;  %v1747_v37 = vmul.f32 %v4658_v14, %v1675_v18 }
 0x3fc   :  { %1808 = vperm.xlu1 %3670, %v1741_v54   ;;  %1805 = vperm.xlu0 %3669, %v1740_v36   ;;  %v1748_v48 = vmul.f32 %v4664_v9, %v1679_v10  ;;  %v1749_v22 = vmul.f32 %v4622_v40, %v1679_v10  ;;  %v1683_v49 = vrot.slane %v3736_v29, %v4575_v27 }
 0x3fd   :  { %v1687_v14 = vrot.slane %v3736_v29, %v4580_v32  ;;  %v1691_v40 = vrot.slane %v3736_v29, %v4589_v46 }
 0x3fe   :  { %v1750_v43 = vmul.f32 %v4672_v6, %v1683_v49  ;;  %v1751_v55 = vmul.f32 %v4629_v47, %v1683_v49  ;;  %v5168_v49 = vld [vmem:[#allocation26_spill] sm:$0xff] }
 0x3ff   :  { %v1752_v23 = vmul.f32 %v4681_v12, %v1687_v14  ;;  %v1753_v9 = vmul.f32 %v4638_v31, %v1687_v14  ;;  %v1754_v16 = vmul.f32 %v4690_v7, %v1691_v40  ;;  %v1755_v19 = vmul.f32 %v4648_v61, %v1691_v40 }
 0x400   :  { %1811 = vperm.xlu1 %3670, %v1742_v11   ;;  %1814 = vperm.xlu0 %3669, %v1743_v13  }
 0x404   :  { %1817 = vperm.xlu1 %3670, %v1744_v44   ;;  %1820 = vperm.xlu0 %3669, %v1745_v24   ;;  %v5165_v44 = vld [vmem:[#allocation24_spill] sm:$0xff]  ;;  %v5166_v24 = vld [vmem:[#allocation23_spill] sm:$0xff] }
 0x405   :  { %v5167_v18 = vpack.c.bf16 %v5165_v44, %v5166_v24 }
 0x408   :  { %1823 = vperm.xlu1 %3670, %v1746_v26   ;;  %1826 = vperm.xlu0 %3669, %v1747_v37  }
 0x40c   :  { %1829 = vperm.xlu1 %3670, %v1748_v48   ;;  %1832 = vperm.xlu0 %3669, %v1749_v22   ;;  %v1655_v33 = vpop.xlane.xlu0 %1654 }
 0x40d   :  { %3737 = vrcp.f32 %v1655_v33  ;;  %v5169_v33 = vld [vmem:[#allocation25_spill] sm:$0xff] }
 0x410   :  { %1835 = vperm.xlu1 %3670, %v1750_v43   ;;  %1838 = vperm.xlu0 %3669, %v1751_v55   ;;  %v5170_v43 = vpack.c.bf16 %v5168_v49, %v5169_v33 }
 0x414   :  { %1841 = vperm.xlu1 %3670, %v1752_v23   ;;  %1844 = vperm.xlu0 %3669, %v1753_v9  }
 0x417   :  { %v3738_v21 = vpop.eup %3737 }
 0x418   :  { %1847 = vperm.xlu1 %3670, %v1754_v16   ;;  %1850 = vperm.xlu0 %3669, %v1755_v19   ;;  %v1695_v47 = vrot.slane %v3738_v21, %v4257_v28  ;;  %v1699_v12 = vrot.slane %v3738_v21, %v4562_v42  ;;  %v1703_v7 = vrot.slane %v3738_v21, %v4572_v35  ;;  %v5171_v16 = vld [vmem:[#allocation28_spill] sm:$0xff]  ;;  %v5172_v19 = vld [vmem:[#allocation27_spill] sm:$0xff] }
 0x419   :  { %v1723_v25 = vrot.slane %v3738_v21, %v4589_v46 }
 0x41a   :  { %v1757_v6 = vmul.f32 %v4670_v8, %v1695_v47  ;;  %v1756_v20 = vmul.f32 %v4698_v52, %v1695_v47  ;;  %v1759_v31 = vmul.f32 %v4679_v38, %v1699_v12  ;;  %v1758_v17 = vmul.f32 %v4705_v63, %v1699_v12  ;;  %v5157_v63 = vld [vmem:[#allocation51_spill] sm:$0xff] }
 0x41b   :  { %v1761_v61 = vmul.f32 %v4688_v30, %v1703_v7  ;;  %v1760_v28 = vmul.f32 %v4712_v60, %v1703_v7  ;;  %v1707_v8 = vrot.slane %v3738_v21, %v4598_v56  ;;  %v1711_v38 = vrot.slane %v3738_v21, %v4566_v50  ;;  %v5159_v60 = vld [vmem:[#allocation52_spill] sm:$0xff]  ;;  %v5175_v7 = vld [vmem:[#allocation29_spill] sm:$0xff] }
 0x41c   :  { %1856 = vperm.xlu0 %3669, %v1757_v6   ;;  %1853 = vperm.xlu1 %3670, %v1756_v20   ;;  %v1715_v30 = vrot.slane %v3738_v21, %v4575_v27  ;;  %v1771_v27 = vmul.f32 %v5163_v53, %v1723_v25  ;;  %v1770_v29 = vmul.f32 %v5164_v4, %v1723_v25 }
 0x41d   :  { %v1763_v42 = vmul.f32 %v4696_v3, %v1707_v8  ;;  %v1762_v52 = vmul.f32 %v4719_v57, %v1707_v8  ;;  %v1765_v35 = vmul.f32 %v5157_v63, %v1711_v38  ;;  %v1764_v5 = vmul.f32 %v5158_v34, %v1711_v38  ;;  %v5161_v57 = vld [vmem:[#allocation53_spill] sm:$0xff]  ;;  %v5177_v63 = vld [vmem:[#allocation32_spill] sm:$0xff] }
 0x41e   :  { %v1767_v56 = vmul.f32 %v5159_v60, %v1715_v30  ;;  %v1766_v62 = vmul.f32 %v5160_v2, %v1715_v30  ;;  %v1719_v3 = vrot.slane %v3738_v21, %v4580_v32  ;;  %v5173_v21 = vpack.c.bf16 %v5171_v16, %v5172_v19 }
 0x420   :  { %1862 = vperm.xlu0 %3669, %v1759_v31   ;;  %1859 = vperm.xlu1 %3670, %v1758_v17   ;;  %v1769_v50 = vmul.f32 %v5161_v57, %v1719_v3  ;;  %v1768_v45 = vmul.f32 %v5162_v15, %v1719_v3  ;;  %v5174_v17 = vld [vmem:[#allocation30_spill] sm:$0xff]  ;;  %v5181_v3 = vld [vmem:[#allocation33_spill] sm:$0xff] }
 0x424   :  { %1868 = vperm.xlu0 %3669, %v1761_v61   ;;  %1865 = vperm.xlu1 %3670, %v1760_v28   ;;  %v5176_v61 = vpack.c.bf16 %v5174_v17, %v5175_v7 }
 0x428   :  { %1874 = vperm.xlu0 %3669, %v1763_v42   ;;  %1871 = vperm.xlu1 %3670, %v1762_v52  }
 0x42c   :  { %1880 = vperm.xlu0 %3669, %v1765_v35   ;;  %1877 = vperm.xlu1 %3670, %v1764_v5   ;;  %v5178_v35 = vld [vmem:[#allocation31_spill] sm:$0xff] }
 0x42d   :  { %v5179_v34 = vpack.c.bf16 %v5177_v63, %v5178_v35 }
 0x430   :  { %1886 = vperm.xlu0 %3669, %v1767_v56   ;;  %1883 = vperm.xlu1 %3670, %v1766_v62   ;;  %v5180_v62 = vld [vmem:[#allocation34_spill] sm:$0xff] }
 0x431   :  { %v5182_v57 = vpack.c.bf16 %v5180_v62, %v5181_v3 }
 0x434   :  { %1892 = vperm.xlu0 %3669, %v1769_v50   ;;  %1889 = vperm.xlu1 %3670, %v1768_v45  }
 0x438   :  { %1898 = vperm.xlu0 %3669, %v1771_v27   ;;  %1895 = vperm.xlu1 %3670, %v1770_v29  }
 0x47b   :  { %v1809_v39 = vpop.permute.xlu1 %1808  ;;  %v1806_v54 = vpop.permute.xlu0 %1805 }
 0x47c   :  { %v1907_v32 = vrot.slane %v1809_v39, %v4367_v0  ;;  %v1903_v36 = vrot.slane %v1806_v54, %v4382_v1  ;;  %v5183_v54 = vld [vmem:[#allocation36_spill] sm:$0xff] }
 0x47e   :  { %v1908_v41 = vsel %vm1017_vm1, %v1907_v32, %v1903_v36  ;;  %v5184_v32 = vld [vmem:[#allocation35_spill] sm:$0xff] }
 0x47f   :  { %v1812_v58 = vpop.permute.xlu1 %1811  ;;  %3481 = vmatmul.mubr.msk.f32.vlgmr.msra.gmra.mrb[2].mxu1 %vm1177_vm9, %v1908_v41  ;;  %v1815_v46 = vpop.permute.xlu0 %1814  ;;  %v5185_v36 = vpack.c.bf16 %v5183_v54, %v5184_v32  ;;  %v5205_v54 = vld [vmem:[#allocation49_spill] sm:$0xff] }
 0x480   :  { %v1912_v11 = vrot.slane %v1812_v58, %v4382_v1  ;;  %v1916_v13 = vrot.slane %v1815_v46, %v4367_v0  ;;  %3609 = vmatpush3.bf16.msra.mxu1 %v5167_v18  ;;  %3487 = vmatprep.mubr.msk.f32.mxu1 %vm3938_vm10, %v3939_v59 }
 0x481   :  { %3610 = vmatprep.subr.bf16.mxu1 %v3937_v51 }
 0x482   :  { %v1917_v26 = vsel %vm1017_vm1, %v1916_v13, %v1912_v11 }
 0x483   :  { %v1818_v37 = vpop.permute.xlu1 %1817  ;;  %3488 = vmatmul.mubr.msk.f32.vlgmr.msra.gmra.mrb[4].mxu1 %vm1177_vm9, %v1917_v26  ;;  %v1821_v10 = vpop.permute.xlu0 %1820  ;;  %v2044_v50 = vsel %vm1154_vm2, %v1917_v26, %v1908_v41  ;;  %v5186_v26 = vld [vmem:[#allocation38_spill] sm:$0xff] }
 0x484   :  { %v1921_v48 = vrot.slane %v1818_v37, %v4382_v1  ;;  %v1925_v22 = vrot.slane %v1821_v10, %v4367_v0  ;;  %3612 = vmatpush3.bf16.msra.mxu1 %v5170_v43  ;;  %3494 = vmatprep.mubr.msk.f32.mxu1 %vm3938_vm10, %v3939_v59  ;;  %v5187_v37 = vld [vmem:[#allocation37_spill] sm:$0xff] }
 0x485   :  { %3613 = vmatprep.subr.bf16.mxu1 %v3937_v51  ;;  %v5188_v10 = vpack.c.bf16 %v5186_v26, %v5187_v37 }
 0x486   :  { %v1926_v55 = vsel %vm1017_vm1, %v1925_v22, %v1921_v48 }
 0x487   :  { %v1824_v14 = vpop.permute.xlu1 %1823  ;;  %3495 = vmatmul.mubr.msk.f32.vlgmr.msra.gmra.mrb[6].mxu1 %vm1177_vm9, %v1926_v55  ;;  %v1827_v23 = vpop.permute.xlu0 %1826  ;;  %v2045_v15 = vsel %vm1156_vm3, %v1926_v55, %v2044_v50  ;;  %v5189_v55 = vld [vmem:[#allocation40_spill] sm:$0xff] }
 0x488   :  { %v1930_v9 = vrot.slane %v1824_v14, %v4382_v1  ;;  %v1934_v40 = vrot.slane %v1827_v23, %v4367_v0  ;;  %3615 = vmatpush3.bf16.msra.mxu1 %v5173_v21  ;;  %3501 = vmatprep.mubr.msk.f32.mxu1 %vm3938_vm10, %v3939_v59  ;;  %v5190_v14 = vld [vmem:[#allocation39_spill] sm:$0xff]  ;;  %v5201_v50 = vld [vmem:[#allocation48_spill] sm:$0xff] }
 0x489   :  { %3616 = vmatprep.subr.bf16.mxu1 %v3937_v51  ;;  %v5191_v23 = vpack.c.bf16 %v5189_v55, %v5190_v14 }
 0x48a   :  { %v1935_v47 = vsel %vm1017_vm1, %v1934_v40, %v1930_v9 }
 0x48b   :  { %v1830_v6 = vpop.permute.xlu1 %1829  ;;  %3502 = vmatmul.mubr.msk.f32.vlgmr.msra.gmra.mrb[8].mxu1 %vm1177_vm9, %v1935_v47  ;;  %v1833_v20 = vpop.permute.xlu0 %1832  ;;  %v2046_v25 = vsel %vm1158_vm4, %v1935_v47, %v2045_v15  ;;  %v5192_v47 = vld [vmem:[#allocation42_spill] sm:$0xff]  ;;  %v5202_v15 = vld [vmem:[#allocation47_spill] sm:$0xff] }
 0x48c   :  { %v1939_v12 = vrot.slane %v1830_v6, %v4382_v1  ;;  %v1943_v31 = vrot.slane %v1833_v20, %v4367_v0  ;;  %3618 = vmatpush3.bf16.msra.mxu1 %v5176_v61  ;;  %3508 = vmatprep.mubr.msk.f32.mxu1 %vm3938_vm10, %v3939_v59  ;;  %v5193_v6 = vld [vmem:[#allocation41_spill] sm:$0xff] }
 0x48d   :  { %3619 = vmatprep.subr.bf16.mxu1 %v3937_v51  ;;  %v5194_v20 = vpack.c.bf16 %v5192_v47, %v5193_v6 }
 0x48e   :  { %v1944_v28 = vsel %vm1017_vm1, %v1943_v31, %v1939_v12 }
 0x48f   :  { %v1836_v8 = vpop.permute.xlu1 %1835  ;;  %3509 = vmatmul.mubr.msk.f32.vlgmr.msra.gmra.mrb[10].mxu1 %vm1177_vm9, %v1944_v28  ;;  %v1839_v42 = vpop.permute.xlu0 %1838  ;;  %v2047_v4 = vsel %vm1160_vm5, %v1944_v28, %v2046_v25  ;;  %v5195_v28 = vld [vmem:[#allocation44_spill] sm:$0xff] }
 0x490   :  { %v1948_v52 = vrot.slane %v1836_v8, %v4382_v1  ;;  %v1952_v38 = vrot.slane %v1839_v42, %v4367_v0  ;;  %3621 = vmatpush3.bf16.msra.mxu1 %v5179_v34  ;;  %3515 = vmatprep.mubr.msk.f32.mxu1 %vm3938_vm10, %v3939_v59  ;;  %v5196_v8 = vld [vmem:[#allocation43_spill] sm:$0xff] }
 0x491   :  { %3622 = vmatprep.subr.bf16.mxu1 %v3937_v51  ;;  %v5197_v42 = vpack.c.bf16 %v5195_v28, %v5196_v8 }
 0x492   :  { %v1953_v5 = vsel %vm1017_vm1, %v1952_v38, %v1948_v52 }
 0x493   :  { %v1842_v30 = vpop.permute.xlu1 %1841  ;;  %3516 = vmatmul.mubr.msk.f32.vlgmr.msra.gmra.mrb[12].mxu1 %vm1177_vm9, %v1953_v5  ;;  %v1845_v60 = vpop.permute.xlu0 %1844  ;;  %v2048_v41 = vsel %vm1162_vm6, %v1953_v5, %v2047_v4  ;;  %v5198_v5 = vld [vmem:[#allocation46_spill] sm:$0xff] }
 0x494   :  { %v1957_v56 = vrot.slane %v1842_v30, %v4382_v1  ;;  %v1961_v2 = vrot.slane %v1845_v60, %v4367_v0  ;;  %3624 = vmatpush3.bf16.msra.mxu1 %v5182_v57  ;;  %3522 = vmatprep.mubr.msk.f32.mxu1 %vm3938_vm10, %v3939_v59  ;;  %v5199_v30 = vld [vmem:[#allocation45_spill] sm:$0xff] }
 0x495   :  { %3625 = vmatprep.subr.bf16.mxu1 %v3937_v51  ;;  %v5200_v60 = vpack.c.bf16 %v5198_v5, %v5199_v30 }
 0x496   :  { %v1962_v45 = vsel %vm1017_vm1, %v1961_v2, %v1957_v56 }
 0x497   :  { %v1848_v53 = vpop.permute.xlu1 %1847  ;;  %3523 = vmatmul.mubr.msk.f32.vlgmr.msra.gmra.mrb[14].mxu1 %vm1177_vm9, %v1962_v45  ;;  %v1851_v27 = vpop.permute.xlu0 %1850  ;;  %v2049_v58 = vsel %vm1164_vm7, %v1962_v45, %v2048_v41  ;;  %v5203_v45 = vpack.c.bf16 %v5201_v50, %v5202_v15 }
 0x498   :  { %v1966_v29 = vrot.slane %v1848_v53, %v4382_v1  ;;  %v1970_v39 = vrot.slane %v1851_v27, %v4367_v0  ;;  %3627 = vmatpush3.bf16.msra.mxu1 %v5185_v36  ;;  %3529 = vmatprep.mubr.msk.f32.mxu1 %vm3938_vm10, %v3939_v59 }
 0x499   :  { %3628 = vmatprep.subr.bf16.mxu1 %v3937_v51 }
 0x49a   :  { %v1971_v46 = vsel %vm1017_vm1, %v1970_v39, %v1966_v29  ;;  %v5204_v39 = vld [vmem:[#allocation50_spill] sm:$0xff] }
 0x49b   :  { %v1854_v11 = vpop.permute.xlu1 %1853  ;;  %3530 = vmatmul.mubr.msk.f32.vlgmr.msra.gmra.mrb[16].mxu1 %vm1177_vm9, %v1971_v46  ;;  %v1857_v13 = vpop.permute.xlu0 %1856  ;;  %v2050_v44 = vsel %vm1166_vm8, %v1971_v46, %v2049_v58  ;;  %v5206_v32 = vpack.c.bf16 %v5204_v39, %v5205_v54 }
 0x49c   :  { %v1975_v24 = vrot.slane %v1854_v11, %v4382_v1  ;;  %v1979_v18 = vrot.slane %v1857_v13, %v4367_v0  ;;  %3630 = vmatpush3.bf16.msra.mxu1 %v5188_v10  ;;  %3536 = vmatprep.mubr.msk.f32.mxu1 %vm3938_vm10, %v3939_v59  ;;  %2060 = vst.msk [vmem:[#allocation15] sm:$0xff] %vm1177_vm9, %v2050_v44 }
 0x49d   :  { %3631 = vmatprep.subr.bf16.mxu1 %v3937_v51 }
 0x49e   :  { %v1980_v48 = vsel %vm1017_vm1, %v1979_v18, %v1975_v24 }
 0x49f   :  { %v1860_v22 = vpop.permute.xlu1 %1859  ;;  %3537 = vmatmul.mubr.msk.f32.vlgmr.msra.gmra.mrb[18].mxu1 %vm1177_vm9, %v1980_v48  ;;  %v1863_v49 = vpop.permute.xlu0 %1862 }
 0x4a0   :  { %v1984_v33 = vrot.slane %v1860_v22, %v4382_v1  ;;  %v1988_v43 = vrot.slane %v1863_v49, %v4367_v0  ;;  %3633 = vmatpush3.bf16.msra.mxu1 %v5191_v23  ;;  %3543 = vmatprep.mubr.msk.f32.mxu1 %vm3938_vm10, %v3939_v59 }
 0x4a1   :  { %3634 = vmatprep.subr.bf16.mxu1 %v3937_v51 }
 0x4a2   :  { %v1989_v9 = vsel %vm1017_vm1, %v1988_v43, %v1984_v33 }
 0x4a3   :  { %v1866_v40 = vpop.permute.xlu1 %1865  ;;  %3544 = vmatmul.mubr.msk.f32.vlgmr.msra.gmra.mrb[20].mxu1 %vm1177_vm9, %v1989_v9  ;;  %v1869_v16 = vpop.permute.xlu0 %1868  ;;  %v2051_v36 = vsel %vm1154_vm2, %v1989_v9, %v1980_v48 }
 0x4a4   :  { %v1993_v19 = vrot.slane %v1866_v40, %v4382_v1  ;;  %v1997_v21 = vrot.slane %v1869_v16, %v4367_v0  ;;  %3636 = vmatpush3.bf16.msra.mxu1 %v5194_v20  ;;  %3550 = vmatprep.mubr.msk.f32.mxu1 %vm3938_vm10, %v3939_v59 }
 0x4a5   :  { %3637 = vmatprep.subr.bf16.mxu1 %v3937_v51 }
 0x4a6   :  { %v1998_v12 = vsel %vm1017_vm1, %v1997_v21, %v1993_v19 }
 0x4a7   :  { %v1872_v31 = vpop.permute.xlu1 %1871  ;;  %3551 = vmatmul.mubr.msk.f32.vlgmr.msra.gmra.mrb[22].mxu1 %vm1177_vm9, %v1998_v12  ;;  %v1875_v17 = vpop.permute.xlu0 %1874 }
 0x4a8   :  { %v2002_v7 = vrot.slane %v1872_v31, %v4382_v1  ;;  %v2006_v61 = vrot.slane %v1875_v17, %v4367_v0  ;;  %3639 = vmatpush3.bf16.msra.mxu1 %v5197_v42  ;;  %3557 = vmatprep.mubr.msk.f32.mxu1 %vm3938_vm10, %v3939_v59 }
 0x4a9   :  { %3640 = vmatprep.subr.bf16.mxu1 %v3937_v51 }
 0x4aa   :  { %v2007_v52 = vsel %vm1017_vm1, %v2006_v61, %v2002_v7 }
 0x4ab   :  { %v1878_v38 = vpop.permute.xlu1 %1877  ;;  %3558 = vmatmul.mubr.msk.f32.vlgmr.msra.gmra.mrb[24].mxu1 %vm1177_vm9, %v2007_v52  ;;  %v1881_v63 = vpop.permute.xlu0 %1880 }
 0x4ac   :  { %v2011_v35 = vrot.slane %v1878_v38, %v4382_v1  ;;  %v2015_v34 = vrot.slane %v1881_v63, %v4367_v0  ;;  %3642 = vmatpush3.bf16.msra.mxu1 %v5200_v60  ;;  %3564 = vmatprep.mubr.msk.f32.mxu1 %vm3938_vm10, %v3939_v59 }
 0x4ad   :  { %3643 = vmatprep.subr.bf16.mxu1 %v3937_v51 }
 0x4ae   :  { %v2016_v56 = vsel %vm1017_vm1, %v2015_v34, %v2011_v35 }
 0x4af   :  { %v1884_v2 = vpop.permute.xlu1 %1883  ;;  %3565 = vmatmul.mubr.msk.f32.vlgmr.msra.gmra.mrb[26].mxu1 %vm1177_vm9, %v2016_v56  ;;  %v1887_v62 = vpop.permute.xlu0 %1886 }
 0x4b0   :  { %v2020_v3 = vrot.slane %v1884_v2, %v4382_v1  ;;  %v2024_v57 = vrot.slane %v1887_v62, %v4367_v0  ;;  %3645 = vmatpush3.bf16.msra.mxu1 %v5203_v45  ;;  %3571 = vmatprep.mubr.msk.f32.mxu1 %vm3938_vm10, %v3939_v59 }
 0x4b1   :  { %3646 = vmatprep.subr.bf16.mxu1 %v3937_v51  ;;  %v2052_v51 = vsel %vm1156_vm3, %v1998_v12, %v2051_v36 }
 0x4b2   :  { %v2025_v25 = vsel %vm1017_vm1, %v2024_v57, %v2020_v3  ;;  %v2053_v58 = vsel %vm1158_vm4, %v2007_v52, %v2052_v51 }
 0x4b3   :  { %v1890_v53 = vpop.permute.xlu1 %1889  ;;  %3572 = vmatmul.mubr.msk.f32.vlgmr.msra.gmra.mrb[28].mxu1 %vm1177_vm9, %v2025_v25  ;;  %v1893_v27 = vpop.permute.xlu0 %1892  ;;  %v2054_v13 = vsel %vm1160_vm5, %v2016_v56, %v2053_v58 }
 0x4b4   :  { %v2029_v4 = vrot.slane %v1890_v53, %v4382_v1  ;;  %v2033_v29 = vrot.slane %v1893_v27, %v4367_v0  ;;  %3648 = vmatpush3.bf16.msra.mxu1 %v5206_v32  ;;  %3578 = vmatprep.mubr.msk.f32.mxu1 %vm3938_vm10, %v3939_v59  ;;  %v2055_v59 = vsel %vm1162_vm6, %v2025_v25, %v2054_v13 }
 0x4b6   :  { %v2034_v41 = vsel %vm1017_vm1, %v2033_v29, %v2029_v4 }
 0x4b7   :  { %v1896_v46 = vpop.permute.xlu1 %1895  ;;  %3579 = vmatmul.mubr.msk.f32.vlgmr.msra.gmra.mrb[30].mxu1 %vm1177_vm9, %v2034_v41  ;;  %v1899_v11 = vpop.permute.xlu0 %1898  ;;  %v2056_v18 = vsel %vm1164_vm7, %v2034_v41, %v2055_v59 }
 0x4b8   :  { %v2038_v44 = vrot.slane %v1896_v46, %v4382_v1  ;;  %v2042_v24 = vrot.slane %v1899_v11, %v4367_v0 }
 0x4ba   :  { %v2043_v26 = vsel %vm1017_vm1, %v2042_v24, %v2038_v44 }
 0x4bb   :  { %3586 = vmatmul.mubr.msk.f32.vlgmr.msra.gmra.mrb[32].mxu0 %vm1177_vm9, %v2043_v26  ;;  %v2057_v37 = vsel %vm1166_vm8, %v2043_v26, %v2056_v18 }
 0x4bc   :  { %2061 = vst.msk [vmem:[#allocation15 + $0x8] sm:$0xff] %vm1177_vm9, %v2057_v37 }
 0x4bd   :  { %3882 = shalt.err (!%p3879_p10)
}
 0x4be   :  { %s3883_s19 = scalar_lea.hbm %s5080_s8, 256 }
 0x4bf   :  { %p3884_p11 = scmp.ne.s32.totalorder %s5080_s8, %s3883_s19  ;;  %p3887_p12 = scmp.lt.u32.totalorder %s3883_s19, %s5080_s8 }
 0x4c1   :  { %p3889_p13 = pnand %p3887_p12, %p3884_p11 }
 0x4c3   :  { %3892 = shalt.err (!%p3889_p13)
}
 0x4c4   :  { %3254 = dma.vmem_to_hbm [thread:$0]  %s3249_s13, 256, %s5080_s8, [#allocation16], %s3929_s17, %s3929_s17, %s3930_s18   ;;  %vm3214_vm11 = vcmask 253952  }
 0x4c5   :  { %s3941_s8 = smov [#allocation14]  }
 0x4c6   :  { %s3236_s17 = sshll.u32 %s3941_s8, 4  ;;  %s3237_s17 = int_to_ptr.vmem [resolvable:$true] %s3236_s17 }
 0x4c7   :  { %s3893_s18 = scalar_lea.vmem %s3237_s17, 256  ;;  %p3898_p1 = scmp.lt.s32.totalorder %s3237_s17, %s3237_s17 }
 0x4c8   :  { %p3894_p0 = scmp.ne.s32.totalorder %s3237_s17, %s3893_s18  ;;  %p3899_p2 = scmp.lt.s32.totalorder %s3893_s18, %s3893_s18 }
 0x4ca   :  { %p3900_p3 = por %p3899_p2, %p3898_p1 }
 0x4cc   :  { %p3901_p4 = pnand %p3900_p3, %p3894_p0 }
 0x552   :  { %v2130_v0 = vpop.f32.mrb[2].mxu1 }
 0x553   :  { %3215 = vst.msk [vmem:[#allocation14] sm:$0x1] %vm3214_vm11, %v2130_v0  ;;  %v3482_v1 = vpop.f32.mrb[3].mxu1 }
 0x556   :  { %v2202_v10 = vpop.f32.mrb[4].mxu1 }
 0x557   :  { %3216 = vst.msk [vmem:[#allocation14 + $0x1] sm:$0x1] %vm3214_vm11, %v2202_v10  ;;  %v3489_v48 = vpop.f32.mrb[5].mxu1 }
 0x55a   :  { %v2274_v22 = vpop.f32.mrb[6].mxu1 }
 0x55b   :  { %3217 = vst.msk [vmem:[#allocation14 + $0x2] sm:$0x1] %vm3214_vm11, %v2274_v22  ;;  %v3496_v49 = vpop.f32.mrb[7].mxu1 }
 0x55e   :  { %v2346_v33 = vpop.f32.mrb[8].mxu1 }
 0x55f   :  { %3218 = vst.msk [vmem:[#allocation14 + $0x3] sm:$0x1] %vm3214_vm11, %v2346_v33  ;;  %v3503_v43 = vpop.f32.mrb[9].mxu1 }
 0x562   :  { %v2418_v55 = vpop.f32.mrb[10].mxu1 }
 0x563   :  { %3219 = vst.msk [vmem:[#allocation14 + $0x4] sm:$0x1] %vm3214_vm11, %v2418_v55  ;;  %v3510_v14 = vpop.f32.mrb[11].mxu1 }
 0x566   :  { %v2490_v23 = vpop.f32.mrb[12].mxu1 }
 0x567   :  { %3220 = vst.msk [vmem:[#allocation14 + $0x5] sm:$0x1] %vm3214_vm11, %v2490_v23  ;;  %v3517_v9 = vpop.f32.mrb[13].mxu1 }
 0x56a   :  { %v2562_v40 = vpop.f32.mrb[14].mxu1 }
 0x56b   :  { %3221 = vst.msk [vmem:[#allocation14 + $0x6] sm:$0x1] %vm3214_vm11, %v2562_v40  ;;  %v3524_v16 = vpop.f32.mrb[15].mxu1 }
 0x56e   :  { %v2634_v19 = vpop.f32.mrb[16].mxu1 }
 0x56f   :  { %3222 = vst.msk [vmem:[#allocation14 + $0x7] sm:$0x1] %vm3214_vm11, %v2634_v19  ;;  %v3531_v21 = vpop.f32.mrb[17].mxu1 }
 0x572   :  { %v2706_v47 = vpop.f32.mrb[18].mxu1 }
 0x573   :  { %3223 = vst.msk [vmem:[#allocation14 + $0x8] sm:$0x1] %vm3214_vm11, %v2706_v47  ;;  %v3538_v6 = vpop.f32.mrb[19].mxu1 }
 0x576   :  { %v2778_v20 = vpop.f32.mrb[20].mxu1 }
 0x577   :  { %3224 = vst.msk [vmem:[#allocation14 + $0x9] sm:$0x1] %vm3214_vm11, %v2778_v20  ;;  %v3545_v12 = vpop.f32.mrb[21].mxu1 }
 0x57a   :  { %v2850_v31 = vpop.f32.mrb[22].mxu1 }
 0x57b   :  { %3225 = vst.msk [vmem:[#allocation14 + $0xa] sm:$0x1] %vm3214_vm11, %v2850_v31  ;;  %v3552_v17 = vpop.f32.mrb[23].mxu1 }
 0x57e   :  { %v2922_v7 = vpop.f32.mrb[24].mxu1 }
 0x57f   :  { %3226 = vst.msk [vmem:[#allocation14 + $0xb] sm:$0x1] %vm3214_vm11, %v2922_v7  ;;  %v3559_v61 = vpop.f32.mrb[25].mxu1 }
 0x582   :  { %v2994_v28 = vpop.f32.mrb[26].mxu1 }
 0x583   :  { %3227 = vst.msk [vmem:[#allocation14 + $0xc] sm:$0x1] %vm3214_vm11, %v2994_v28  ;;  %v3566_v8 = vpop.f32.mrb[27].mxu1 }
 0x586   :  { %v3066_v42 = vpop.f32.mrb[28].mxu1 }
 0x587   :  { %3228 = vst.msk [vmem:[#allocation14 + $0xd] sm:$0x1] %vm3214_vm11, %v3066_v42  ;;  %v3573_v52 = vpop.f32.mrb[29].mxu1 }
 0x58a   :  { %v3138_v38 = vpop.f32.mrb[30].mxu1 }
 0x58b   :  { %3229 = vst.msk [vmem:[#allocation14 + $0xe] sm:$0x1] %vm3214_vm11, %v3138_v38  ;;  %v3580_v63 = vpop.f32.mrb[31].mxu1 }
 0x58e   :  { %v3210_v35 = vpop.f32.mrb[32].mxu0 }
 0x58f   :  { %3230 = vst.msk [vmem:[#allocation14 + $0xf] sm:$0x1] %vm3214_vm11, %v3210_v35  ;;  %v3587_v34 = vpop.f32.mrb[33].mxu0 }
 0x590   :  { %3904 = shalt.err (!%p3901_p4)
}
 0x591   :  { %s3905_s24 = scalar_lea.hbm %s5079_s7, 256 }
 0x592   :  { %p3906_p5 = scmp.ne.s32.totalorder %s5079_s7, %s3905_s24  ;;  %p3909_p6 = scmp.lt.u32.totalorder %s3905_s24, %s5079_s7 }
 0x594   :  { %p3911_p7 = pnand %p3909_p6, %p3906_p5 }
 0x596   :  { %3914 = shalt.err (!%p3911_p7)
}
 0x597   :  { %s3942_s1 = smov 16   ;;  %s3943_s28 = smov 1  }
 0x598   :  { %3242 = dma.vmem_to_hbm [thread:$0]  %s3237_s17, 256, %s5079_s7, [#allocation5], %s3942_s1, %s3942_s1, %s3943_s28  }
 0x599   :  { %3923 = dma.done.wait [#allocation5], 256  }
 0x59a   :  { %3924 = vsyncadd [#allocation5], 4294967040 }
 0x59b   :  { %3925 = dma.done.wait [#allocation16], 256  }
 0x59c   :  { %3926 = vsyncadd [#allocation16], 4294967040 }
 0x59d   :  { %3261 = vsyncpa [#allocation4], 1 }
 0x59e   :  { %3262 = vsyncpa [#allocation7], 1 }
 0x59f   :  { %3263 = vsyncpa [#allocation10], 1 }
 0x5a0   :  { %3264 = vsyncpa [#allocation13], 1 }
 0x5a1   :  { %3265 = vsyncpa [#allocation5], 1 }
 0x5a2   :  { %3266 = vsyncpa [#allocation16], 1 }

</bundles_post_ra>
